<compile_context>
chip_gen: v7x
topology: tpu7x:2x2x1
jax: 0.10.0
libtpu: 0.0.40
codegen_flags: <defaults>
</compile_context>

<pallas_src>
import jax
import jax.numpy as jnp
from jax.experimental import pallas as pl
from jax.experimental.pallas import tpu as pltpu

LANE = 128            # pad all channel / class dims to a full lane width
C1, C2 = 16, 32       # real conv output channel counts (fixed by the module)
K = 5                 # conv kernel size
NUM_CLASSES = 10
VMEM_LIMIT = 48 * 1024 * 1024   # explicit scoped-VMEM budget (safe on v5e/v6e/v7x)


def _cdiv(a, b):
    return -(-a // b)


def _round_up(a, b):
    return _cdiv(a, b) * b


# ----------------------------- Pallas kernels ------------------------------

def conv1_pool_kernel(p_ref, w_ref, b_ref, o_ref):
    """conv1 (one block-diagonal matmul) + bias + ReLU + 2x2 maxpool.

    p_ref: (TM, 128)  bf16  lane q*32 + (kh*5+kw) = tap of pool quadrant q
    w_ref: (128, 512) bf16  block-diag: rows q*32..q*32+24 -> cols q*128..q*128+15
    b_ref: (1, 128)   f32
    o_ref: (TM, 128)  bf16  lane-dense pooled+ReLU'd output (16 valid channels)
    """
    z = jnp.dot(p_ref[...], w_ref[...], preferred_element_type=jnp.float32)
    m = jnp.maximum(jnp.maximum(z[:, 0:128], z[:, 128:256]),
                    jnp.maximum(z[:, 256:384], z[:, 384:512]))
    o_ref[...] = jnp.maximum(m + b_ref[...], 0.0).astype(o_ref.dtype)


def conv2_fc_kernel(p_ref, w2_ref, b2_ref, wfc_ref, bfc_ref, o_ref):
    """Fused conv2 + bias + ReLU + 2x2 maxpool + FC + log_softmax for TB images.

    p_ref  : (4, 49, TB, 400) bf16   quadrant, pooled spatial pos, image, K
    w2_ref : (400, 128)       bf16
    b2_ref : (1, 128)         f32
    wfc_ref: (49, 128, 128)   bf16   per-spatial-position FC slice (32x10 valid)
    bfc_ref: (1, 128)         f32
    o_ref  : (TB, 128)        f32    log-probs in the first 10 lanes
    """
    tb = o_ref.shape[0]
    w2 = w2_ref[...]
    b2 = b2_ref[...]

    def body(s, acc):
        # conv2 at pooled position s for all TB images: max over the 4 quadrants.
        z = jnp.dot(p_ref[0, s], w2, preferred_element_type=jnp.float32)
        for q in range(1, 4):
            z = jnp.maximum(
                z, jnp.dot(p_ref[q, s], w2, preferred_element_type=jnp.float32))
        h = jnp.maximum(z + b2, 0.0).astype(jnp.bfloat16)           # (TB, 128)
        # FC contribution of spatial position s (h lanes >= 32 are exactly 0).
        return acc + jnp.dot(h, wfc_ref[s], preferred_element_type=jnp.float32)

    acc = jax.lax.fori_loop(0, 49, body, jnp.zeros((tb, LANE), jnp.float32))

    z = acc + bfc_ref[...]
    col = jax.lax.broadcasted_iota(jnp.int32, z.shape, 1)
    valid = col < NUM_CLASSES
    zm = jnp.where(valid, z, -1e30)
    m = jnp.max(zm, axis=1, keepdims=True)
    e = jnp.where(valid, jnp.exp(z - m), 0.0)
    denom = jnp.sum(e, axis=1, keepdims=True)
    o_ref[...] = (z - m - jnp.log(denom)).astype(o_ref.dtype)


# ----------------------------- pallas_call wrappers -------------------------

def conv1_pool_pallas(patches, w_bd, b, *, tm_max=1024):
    """patches: (M, 128) bf16 with M = B*14*14. Returns (M, 128) bf16."""
    m = patches.shape[0]
    n_tiles = max(2, _cdiv(m, tm_max)) if m >= 16 else 1   # >=2: both v7x TCs busy
    tm = _round_up(_cdiv(m, n_tiles), 8)
    n_tiles = _cdiv(m, tm)
    m_pad = n_tiles * tm
    if m_pad != m:                       # zero-pad: partial-tile OOB path never taken
        patches = jnp.pad(patches, ((0, m_pad - m), (0, 0)))
    out = pl.pallas_call(
        conv1_pool_kernel,
        out_shape=jax.ShapeDtypeStruct((m_pad, LANE), jnp.bfloat16),
        grid=(n_tiles,),
        in_specs=[
            pl.BlockSpec((tm, LANE), lambda i: (i, 0)),
            pl.BlockSpec((LANE, 4 * LANE), lambda i: (0, 0)),
            pl.BlockSpec((1, LANE), lambda i: (0, 0)),
        ],
        out_specs=pl.BlockSpec((tm, LANE), lambda i: (i, 0)),
        compiler_params=pltpu.CompilerParams(
            dimension_semantics=("parallel",),
            vmem_limit_bytes=VMEM_LIMIT),
    )(patches, w_bd, b)
    return out[:m]


def conv2_fc_pallas(p2, w2, b2, wfc3, bfc, *, tb_max=8):
    """p2: (4, 49, B, 400) bf16. Returns (B, 128) f32 log-probs (10 valid lanes)."""
    _, _, batch, kk = p2.shape
    if batch <= tb_max:
        b_pad, tb = batch, batch                       # single full-batch block
    else:
        tb = tb_max                                    # multiple of 8 -> valid block
        b_pad = _round_up(batch, tb)
        p2 = jnp.pad(p2, ((0, 0), (0, 0), (0, b_pad - batch), (0, 0)))
    out = pl.pallas_call(
        conv2_fc_kernel,
        out_shape=jax.ShapeDtypeStruct((b_pad, LANE), jnp.float32),
        grid=(b_pad // tb,),
        in_specs=[
            pl.BlockSpec((4, 49, tb, kk), lambda i: (0, 0, i, 0)),
            pl.BlockSpec((kk, LANE), lambda i: (0, 0)),
            pl.BlockSpec((1, LANE), lambda i: (0, 0)),
            pl.BlockSpec((49, LANE, LANE), lambda i: (0, 0, 0)),
            pl.BlockSpec((1, LANE), lambda i: (0, 0)),
        ],
        out_specs=pl.BlockSpec((tb, LANE), lambda i: (i, 0)),
        compiler_params=pltpu.CompilerParams(
            dimension_semantics=("parallel",),
            vmem_limit_bytes=VMEM_LIMIT),
    )(p2, w2, b2, wfc3, bfc)
    return out[:batch]


# ----------------------------- JAX glue -------------------------------------

def build_patches1(x_nhwc):
    """Lane-packed im2col for conv1+pool1.

    Returns (B*14*14, 128) bf16; lane q*32 + (kh*5+kw) holds
    xpad[b, 2*ho + q//2 + kh, 2*wo + q%2 + kw] for pooled output pixel (b,ho,wo).
    """
    b = x_nhwc.shape[0]
    xp = jnp.pad(x_nhwc[..., 0], ((0, 0), (2, 2), (2, 2)))        # (B, 32, 32)
    quads = []
    for dy in range(2):
        for dx in range(2):
            taps = []
            for kh in range(K):
                for kw in range(K):
                    y0, x0 = dy + kh, dx + kw
                    taps.append(xp[:, y0:y0 + 27:2, x0:x0 + 27:2])  # (B,14,14)
            q = jnp.stack(taps, axis=-1)                            # (B,14,14,25)
            quads.append(jnp.pad(q, ((0, 0), (0, 0), (0, 0), (0, 32 - K * K))))
    p = jnp.concatenate(quads, axis=-1)                             # (B,14,14,128)
    return p.reshape(b * 14 * 14, LANE).astype(jnp.bfloat16)


def build_patches2(h1):
    """im2col for conv2 grouped by pool quadrant and pooled spatial position.

    h1: (B, 14, 14, 16) bf16.  Returns (4, 49, B, 400) bf16 with K ordered
    (kh, kw, cin) to match the flattened conv2 weight.
    """
    b = h1.shape[0]
    hp = jnp.pad(h1, ((0, 0), (2, 2), (2, 2), (0, 0)))              # (B,18,18,16)
    taps = [hp[:, kh:kh + 14, kw:kw + 14, :]
            for kh in range(K) for kw in range(K)]
    p = jnp.stack(taps, axis=3).reshape(b, 14, 14, K * K * C1)      # (B,14,14,400)
    p = p.reshape(b, 7, 2, 7, 2, K * K * C1)
    p = jnp.transpose(p, (2, 4, 1, 3, 0, 5))                        # (dy,dx,po,qo,B,K)
    return p.reshape(4, 49, b, K * K * C1).astype(jnp.bfloat16)


def prepare_params(params):
    """One-time weight permute / flatten / pad / bf16 cast (hoisted out of forward)."""
    # conv1 -> block-diagonal (128, 512): one matmul covers all 4 pool quadrants.
    wf1 = jnp.transpose(params["w1"], (2, 3, 1, 0)).reshape(K * K, C1)   # (25, 16)
    w1_bd = jnp.zeros((LANE, 4 * LANE), jnp.float32)
    for q in range(4):
        w1_bd = w1_bd.at[q * 32:q * 32 + K * K, q * LANE:q * LANE + C1].set(wf1)
    # conv2 flattened (kh, kw, cin) x cout, cout padded to 128 lanes.
    wf2 = jnp.transpose(params["w2"], (2, 3, 1, 0)).reshape(K * K * C1, C2)
    # FC weight split per pooled spatial position s: wfc3[s, ch, cls].
    wfc3 = jnp.transpose(params["wfc"].reshape(NUM_CLASSES, C2, 49), (2, 1, 0))
    wfc3 = jnp.pad(wfc3, ((0, 0), (0, LANE - C2), (0, LANE - NUM_CLASSES)))
    return {
        "w1": w1_bd.astype(jnp.bfloat16),                                    # (128, 512)
        "b1": jnp.pad(params["b1"].reshape(1, -1),
                      ((0, 0), (0, LANE - C1))).astype(jnp.float32),         # (1, 128)
        "w2": jnp.pad(wf2, ((0, 0), (0, LANE - C2))).astype(jnp.bfloat16),   # (400, 128)
        "b2": jnp.pad(params["b2"].reshape(1, -1),
                      ((0, 0), (0, LANE - C2))).astype(jnp.float32),         # (1, 128)
        "wfc": wfc3.astype(jnp.bfloat16),                                    # (49,128,128)
        "bfc": jnp.pad(params["bfc"].reshape(1, -1),
                       ((0, 0), (0, LANE - NUM_CLASSES))).astype(jnp.float32),
    }


def cnn_forward(x_nchw, p):
    b = x_nchw.shape[0]
    x = jnp.transpose(x_nchw, (0, 2, 3, 1)).astype(jnp.bfloat16)    # NHWC (B,28,28,1)

    # stage 1: conv1(5x5, pad 2) + bias + relu + 2x2 maxpool (one fused kernel)
    p1 = build_patches1(x)                                          # (B*196, 128) bf16
    h1 = conv1_pool_pallas(p1, p["w1"], p["b1"])                    # (B*196, 128) bf16
    h1 = h1.reshape(b, 14, 14, LANE)[..., :C1]                      # slice fuses into gather

    # stage 2 + head: conv2 + bias + relu + 2x2 maxpool + FC + log_softmax (one kernel)
    p2 = build_patches2(h1)                                         # (4, 49, B, 400) bf16
    logp = conv2_fc_pallas(p2, p["w2"], p["b2"], p["wfc"], p["bfc"])
    return logp[:, :NUM_CLASSES]


# ----------------------------- pure-JAX reference ---------------------------

def reference_forward(x_nchw, params):
    dn = ("NCHW", "OIHW", "NCHW")
    h = jax.lax.conv_general_dilated(
        x_nchw, params["w1"], (1, 1), ((2, 2), (2, 2)), dimension_numbers=dn)
    h = jnp.maximum(h + params["b1"][None, :, None, None], 0.0)
    h = jax.lax.reduce_window(h, -jnp.inf, jax.lax.max,
                              (1, 1, 2, 2), (1, 1, 2, 2), "VALID")
    h = jax.lax.conv_general_dilated(
        h, params["w2"], (1, 1), ((2, 2), (2, 2)), dimension_numbers=dn)
    h = jnp.maximum(h + params["b2"][None, :, None, None], 0.0)
    h = jax.lax.reduce_window(h, -jnp.inf, jax.lax.max,
                              (1, 1, 2, 2), (1, 1, 2, 2), "VALID")
    f = h.reshape(h.shape[0], -1)
    z = f @ params["wfc"].T + params["bfc"]
    return jax.nn.log_softmax(z, axis=1)


# ----------------------------- main ------------------------------------------

if __name__ == "__main__":
    key = jax.random.PRNGKey(0)
    k1, k2, k3, k4 = jax.random.split(key, 4)

    # Deterministic synthetic parameters (PyTorch shape conventions).
    params = {
        "w1": jax.random.normal(k1, (16, 1, 5, 5), jnp.float32) * 0.1,      # Conv2d(1,16,5)
        "b1": jnp.linspace(-0.05, 0.05, 16, dtype=jnp.float32),
        "w2": jax.random.normal(k2, (32, 16, 5, 5), jnp.float32) * 0.05,    # Conv2d(16,32,5)
        "b2": jnp.linspace(-0.05, 0.05, 32, dtype=jnp.float32),
        "wfc": jax.random.normal(k3, (10, 32 * 7 * 7), jnp.float32) * 0.02,  # Linear(1568,10)
        "bfc": jnp.linspace(-0.1, 0.1, 10, dtype=jnp.float32),
    }
    prepped = prepare_params(params)   # weight permute/pad/bf16 hoisted out of forward

    # Input: fc1 expects 32*7*7, so spatial must be 28x28 (MNIST-style), 1 channel.
    x = jax.random.normal(k4, (2, 1, 28, 28), jnp.float32)

    fwd = jax.jit(cnn_forward)
    out = jax.block_until_ready(fwd(x, prepped))
    assert out.shape == (2, 10), out.shape

    ref = jax.block_until_ready(reference_forward(x, params))
    max_err = float(jnp.max(jnp.abs(out - ref)))
    # bf16 operand streams through two convs + FC: tolerance loosened vs. f32.
    assert max_err < 1e-1, f"mismatch vs reference: {max_err}"

    print("KERNEL_OK")
</pallas_src>

<mosaic_0001>
module attributes {stable_mosaic.version = 11 : i64} {
  func.func @conv1_pool_kernel(%arg0: i32, %arg1: memref<200x128xbf16, #tpu.memory_space<vmem>>, %arg2: memref<128x512xbf16, #tpu.memory_space<vmem>>, %arg3: memref<1x128xf32, #tpu.memory_space<vmem>>, %arg4: memref<200x128xbf16, #tpu.memory_space<vmem>>) attributes {dimension_semantics = [#tpu.dimension_semantics<parallel>], iteration_bounds = array<i64: 2>, scalar_prefetch = 0 : i64, scratch_operands = 0 : i64, tpu.core_type = #tpu.core_type<tc>, window_params = [{transform_indices = @transform_0, window_bounds = array<i64: 200, 128>}, {pipeline_mode = #tpu.pipeline_mode<synchronous>, transform_indices = @transform_1, window_bounds = array<i64: 128, 512>}, {pipeline_mode = #tpu.pipeline_mode<synchronous>, transform_indices = @transform_2, window_bounds = array<i64: 1, 128>}, {transform_indices = @transform_3, window_bounds = array<i64: 200, 128>}]} {
    %c0 = arith.constant 0 : index
    %c0_0 = arith.constant 0 : index
    %0 = vector.load %arg1[%c0, %c0_0] : memref<200x128xbf16, #tpu.memory_space<vmem>>, vector<200x128xbf16>
    %c0_1 = arith.constant 0 : index
    %c0_2 = arith.constant 0 : index
    %1 = vector.load %arg2[%c0_1, %c0_2] : memref<128x512xbf16, #tpu.memory_space<vmem>>, vector<128x512xbf16>
    %cst = arith.constant dense<0.000000e+00> : vector<200x512xf32>
    %2 = tpu.matmul %0, %1, %cst {dimension_numbers = #tpu.dot_dimension_numbers<[1], [0], [0], [1], [0, 0, 1, 1], [], []>} : vector<200x128xbf16>, vector<128x512xbf16>, vector<200x512xf32> -> vector<200x512xf32>
    %3 = vector.extract_strided_slice %2 {offsets = [0, 0], sizes = [200, 128], strides = [1, 1]} : vector<200x512xf32> to vector<200x128xf32>
    %4 = vector.extract_strided_slice %2 {offsets = [0, 128], sizes = [200, 128], strides = [1, 1]} : vector<200x512xf32> to vector<200x128xf32>
    %5 = arith.maximumf %3, %4 : vector<200x128xf32>
    %6 = vector.extract_strided_slice %2 {offsets = [0, 256], sizes = [200, 128], strides = [1, 1]} : vector<200x512xf32> to vector<200x128xf32>
    %7 = vector.extract_strided_slice %2 {offsets = [0, 384], sizes = [200, 128], strides = [1, 1]} : vector<200x512xf32> to vector<200x128xf32>
    %8 = arith.maximumf %6, %7 : vector<200x128xf32>
    %9 = arith.maximumf %5, %8 : vector<200x128xf32>
    %c0_3 = arith.constant 0 : index
    %c0_4 = arith.constant 0 : index
    %10 = vector.load %arg3[%c0_3, %c0_4] : memref<1x128xf32, #tpu.memory_space<vmem>>, vector<1x128xf32>
    %11 = vector.broadcast %10 : vector<1x128xf32> to vector<200x128xf32>
    %12 = arith.addf %9, %11 : vector<200x128xf32>
    %cst_5 = arith.constant 0.000000e+00 : f32
    %13 = vector.broadcast %cst_5 : f32 to vector<200x128xf32>
    %14 = arith.maximumf %12, %13 : vector<200x128xf32>
    %15 = arith.truncf %14 : vector<200x128xf32> to vector<200x128xbf16>
    %c0_6 = arith.constant 0 : index
    %c0_7 = arith.constant 0 : index
    %16 = vector.load %arg4[%c0_6, %c0_7] : memref<200x128xbf16, #tpu.memory_space<vmem>>, vector<200x128xbf16>
    tpu.vector_store %arg4[%c0_6, %c0_7], %15 {strides = array<i32>} : memref<200x128xbf16, #tpu.memory_space<vmem>>, vector<200x128xbf16>,
    return
  }
  func.func @transform_0(%arg0: i32) -> (i32, i32) {
    %c0_i32 = arith.constant 0 : i32
    %c0_i32_0 = arith.constant 0 : i32
    return %arg0, %c0_i32 : i32, i32
  }
  func.func @transform_1(%arg0: i32) -> (i32, i32) {
    %c0_i32 = arith.constant 0 : i32
    %c0_i32_0 = arith.constant 0 : i32
    %c0_i32_1 = arith.constant 0 : i32
    return %c0_i32, %c0_i32_0 : i32, i32
  }
  func.func @transform_2(%arg0: i32) -> (i32, i32) {
    %c0_i32 = arith.constant 0 : i32
    %c0_i32_0 = arith.constant 0 : i32
    %c0_i32_1 = arith.constant 0 : i32
    return %c0_i32, %c0_i32_0 : i32, i32
  }
  func.func @transform_3(%arg0: i32) -> (i32, i32) {
    %c0_i32 = arith.constant 0 : i32
    %c0_i32_0 = arith.constant 0 : i32
    return %arg0, %c0_i32 : i32, i32
  }
}

module attributes {stable_mosaic.version = 11 : i64} {
  func.func @conv2_fc_kernel(%arg0: i32, %arg1: memref<4x49x2x400xbf16, #tpu.memory_space<vmem>>, %arg2: memref<400x128xbf16, #tpu.memory_space<vmem>>, %arg3: memref<1x128xf32, #tpu.memory_space<vmem>>, %arg4: memref<49x128x128xbf16, #tpu.memory_space<vmem>>, %arg5: memref<1x128xf32, #tpu.memory_space<vmem>>, %arg6: memref<2x128xf32, #tpu.memory_space<vmem>>) attributes {dimension_semantics = [#tpu.dimension_semantics<parallel>], iteration_bounds = array<i64: 1>, scalar_prefetch = 0 : i64, scratch_operands = 0 : i64, tpu.core_type = #tpu.core_type<tc>, window_params = [{transform_indices = @transform_0, window_bounds = array<i64: 4, 49, 2, 400>}, {pipeline_mode = #tpu.pipeline_mode<synchronous>, transform_indices = @transform_1, window_bounds = array<i64: 400, 128>}, {pipeline_mode = #tpu.pipeline_mode<synchronous>, transform_indices = @transform_2, window_bounds = array<i64: 1, 128>}, {pipeline_mode = #tpu.pipeline_mode<synchronous>, transform_indices = @transform_3, window_bounds = array<i64: 49, 128, 128>}, {pipeline_mode = #tpu.pipeline_mode<synchronous>, transform_indices = @transform_4, window_bounds = array<i64: 1, 128>}, {transform_indices = @transform_5, window_bounds = array<i64: 2, 128>}]} {
    %c0 = arith.constant 0 : index
    %c0_0 = arith.constant 0 : index
    %0 = vector.load %arg2[%c0, %c0_0] : memref<400x128xbf16, #tpu.memory_space<vmem>>, vector<400x128xbf16>
    %c0_1 = arith.constant 0 : index
    %c0_2 = arith.constant 0 : index
    %1 = vector.load %arg3[%c0_1, %c0_2] : memref<1x128xf32, #tpu.memory_space<vmem>>, vector<1x128xf32>
    %cst = arith.constant 0.000000e+00 : f32
    %2 = vector.broadcast %cst : f32 to vector<2x128xf32>
    %c0_i32 = arith.constant 0 : i32
    %c49_i32 = arith.constant 49 : i32
    %3 = arith.addi %c0_i32, %c49_i32 : i32
    %c1_i32 = arith.constant 1 : i32
    %4 = scf.for %arg7 = %c0_i32 to %3 step %c1_i32 iter_args(%arg8 = %2) -> (vector<2x128xf32>)  : i32 {
      %c0_12 = arith.constant 0 : index
      %28 = arith.index_cast %arg7 : i32 to index
      %c0_13 = arith.constant 0 : index
      %c0_14 = arith.constant 0 : index
      %29 = vector.load %arg1[%c0_12, %28, %c0_13, %c0_14] : memref<4x49x2x400xbf16, #tpu.memory_space<vmem>>, vector<1x1x2x400xbf16>
      %30 = vector.shape_cast %29 : vector<1x1x2x400xbf16> to vector<2x400xbf16>
      %cst_15 = arith.constant dense<0.000000e+00> : vector<2x128xf32>
      %31 = tpu.matmul %30, %0, %cst_15 {dimension_numbers = #tpu.dot_dimension_numbers<[1], [0], [0], [1], [0, 0, 1, 1], [], []>} : vector<2x400xbf16>, vector<400x128xbf16>, vector<2x128xf32> -> vector<2x128xf32>
      %c1 = arith.constant 1 : index
      %32 = arith.index_cast %arg7 : i32 to index
      %c0_16 = arith.constant 0 : index
      %c0_17 = arith.constant 0 : index
      %33 = vector.load %arg1[%c1, %32, %c0_16, %c0_17] : memref<4x49x2x400xbf16, #tpu.memory_space<vmem>>, vector<1x1x2x400xbf16>
      %34 = vector.shape_cast %33 : vector<1x1x2x400xbf16> to vector<2x400xbf16>
      %cst_18 = arith.constant dense<0.000000e+00> : vector<2x128xf32>
      %35 = tpu.matmul %34, %0, %cst_18 {dimension_numbers = #tpu.dot_dimension_numbers<[1], [0], [0], [1], [0, 0, 1, 1], [], []>} : vector<2x400xbf16>, vector<400x128xbf16>, vector<2x128xf32> -> vector<2x128xf32>
      %36 = arith.maximumf %31, %35 : vector<2x128xf32>
      %c2 = arith.constant 2 : index
      %37 = arith.index_cast %arg7 : i32 to index
      %c0_19 = arith.constant 0 : index
      %c0_20 = arith.constant 0 : index
      %38 = vector.load %arg1[%c2, %37, %c0_19, %c0_20] : memref<4x49x2x400xbf16, #tpu.memory_space<vmem>>, vector<1x1x2x400xbf16>
      %39 = vector.shape_cast %38 : vector<1x1x2x400xbf16> to vector<2x400xbf16>
      %cst_21 = arith.constant dense<0.000000e+00> : vector<2x128xf32>
      %40 = tpu.matmul %39, %0, %cst_21 {dimension_numbers = #tpu.dot_dimension_numbers<[1], [0], [0], [1], [0, 0, 1, 1], [], []>} : vector<2x400xbf16>, vector<400x128xbf16>, vector<2x128xf32> -> vector<2x128xf32>
      %41 = arith.maximumf %36, %40 : vector<2x128xf32>
      %c3 = arith.constant 3 : index
      %42 = arith.index_cast %arg7 : i32 to index
      %c0_22 = arith.constant 0 : index
      %c0_23 = arith.constant 0 : index
      %43 = vector.load %arg1[%c3, %42, %c0_22, %c0_23] : memref<4x49x2x400xbf16, #tpu.memory_space<vmem>>, vector<1x1x2x400xbf16>
      %44 = vector.shape_cast %43 : vector<1x1x2x400xbf16> to vector<2x400xbf16>
      %cst_24 = arith.constant dense<0.000000e+00> : vector<2x128xf32>
      %45 = tpu.matmul %44, %0, %cst_24 {dimension_numbers = #tpu.dot_dimension_numbers<[1], [0], [0], [1], [0, 0, 1, 1], [], []>} : vector<2x400xbf16>, vector<400x128xbf16>, vector<2x128xf32> -> vector<2x128xf32>
      %46 = arith.maximumf %41, %45 : vector<2x128xf32>
      %47 = vector.broadcast %1 : vector<1x128xf32> to vector<2x128xf32>
      %48 = arith.addf %46, %47 : vector<2x128xf32>
      %cst_25 = arith.constant 0.000000e+00 : f32
      %49 = vector.broadcast %cst_25 : f32 to vector<2x128xf32>
      %50 = arith.maximumf %48, %49 : vector<2x128xf32>
      %51 = arith.truncf %50 : vector<2x128xf32> to vector<2x128xbf16>
      %52 = arith.index_cast %arg7 : i32 to index
      %c0_26 = arith.constant 0 : index
      %c0_27 = arith.constant 0 : index
      %53 = vector.load %arg4[%52, %c0_26, %c0_27] : memref<49x128x128xbf16, #tpu.memory_space<vmem>>, vector<1x128x128xbf16>
      %54 = vector.shape_cast %53 : vector<1x128x128xbf16> to vector<128x128xbf16>
      %cst_28 = arith.constant dense<0.000000e+00> : vector<2x128xf32>
      %55 = tpu.matmul %51, %54, %cst_28 {dimension_numbers = #tpu.dot_dimension_numbers<[1], [0], [0], [1], [0, 0, 1, 1], [], []>} : vector<2x128xbf16>, vector<128x128xbf16>, vector<2x128xf32> -> vector<2x128xf32>
      %56 = arith.addf %arg8, %55 : vector<2x128xf32>
      scf.yield %56 : vector<2x128xf32>
    }
    %c49_i32_3 = arith.constant 49 : i32
    %c0_4 = arith.constant 0 : index
    %c0_5 = arith.constant 0 : index
    %5 = vector.load %arg5[%c0_4, %c0_5] : memref<1x128xf32, #tpu.memory_space<vmem>>, vector<1x128xf32>
    %6 = vector.broadcast %5 : vector<1x128xf32> to vector<2x128xf32>
    %7 = arith.addf %4, %6 : vector<2x128xf32>
    %8 = tpu.iota {dimensions = array<i32: 1>} : vector<2x128xi32>
    %c10_i32 = arith.constant 10 : i32
    %9 = vector.broadcast %c10_i32 : i32 to vector<2x128xi32>
    %10 = arith.cmpi slt, %8, %9 : vector<2x128xi32>
    %cst_6 = arith.constant -1.000000e+30 : f32
    %11 = vector.broadcast %cst_6 : f32 to vector<2x128xf32>
    %12 = arith.select %10, %7, %11 : vector<2x128xi1>, vector<2x128xf32>
    %cst_7 = arith.constant dense<0xFF800000> : vector<2xf32>
    %13 = vector.multi_reduction <maximumf>, %12, %cst_7 [1] : vector<2x128xf32> to vector<2xf32>
    %14 = vector.shape_cast %13 : vector<2xf32> to vector<2x1xf32>
    %15 = vector.broadcast %14 : vector<2x1xf32> to vector<2x128xf32>
    %16 = arith.subf %7, %15 : vector<2x128xf32>
    %17 = math.exp %16 : vector<2x128xf32>
    %cst_8 = arith.constant 0.000000e+00 : f32
    %18 = vector.broadcast %cst_8 : f32 to vector<2x128xf32>
    %19 = arith.select %10, %17, %18 : vector<2x128xi1>, vector<2x128xf32>
    %cst_9 = arith.constant dense<0.000000e+00> : vector<2xf32>
    %20 = vector.multi_reduction <add>, %19, %cst_9 [1] : vector<2x128xf32> to vector<2xf32>
    %21 = vector.shape_cast %20 : vector<2xf32> to vector<2x1xf32>
    %22 = vector.broadcast %14 : vector<2x1xf32> to vector<2x128xf32>
    %23 = arith.subf %7, %22 : vector<2x128xf32>
    %24 = math.log %21 : vector<2x1xf32>
    %25 = vector.broadcast %24 : vector<2x1xf32> to vector<2x128xf32>
    %26 = arith.subf %23, %25 : vector<2x128xf32>
    %c0_10 = arith.constant 0 : index
    %c0_11 = arith.constant 0 : index
    %27 = vector.load %arg6[%c0_10, %c0_11] : memref<2x128xf32, #tpu.memory_space<vmem>>, vector<2x128xf32>
    tpu.vector_store %arg6[%c0_10, %c0_11], %26 {strides = array<i32>} : memref<2x128xf32, #tpu.memory_space<vmem>>, vector<2x128xf32>,
    return
  }
  func.func @transform_0(%arg0: i32) -> (i32, i32, i32, i32) {
    %c0_i32 = arith.constant 0 : i32
    %c0_i32_0 = arith.constant 0 : i32
    %c0_i32_1 = arith.constant 0 : i32
    %c0_i32_2 = arith.constant 0 : i32
    return %c0_i32, %c0_i32_0, %arg0, %c0_i32_1 : i32, i32, i32, i32
  }
  func.func @transform_1(%arg0: i32) -> (i32, i32) {
    %c0_i32 = arith.constant 0 : i32
    %c0_i32_0 = arith.constant 0 : i32
    %c0_i32_1 = arith.constant 0 : i32
    return %c0_i32, %c0_i32_0 : i32, i32
  }
  func.func @transform_2(%arg0: i32) -> (i32, i32) {
    %c0_i32 = arith.constant 0 : i32
    %c0_i32_0 = arith.constant 0 : i32
    %c0_i32_1 = arith.constant 0 : i32
    return %c0_i32, %c0_i32_0 : i32, i32
  }
  func.func @transform_3(%arg0: i32) -> (i32, i32, i32) {
    %c0_i32 = arith.constant 0 : i32
    %c0_i32_0 = arith.constant 0 : i32
    %c0_i32_1 = arith.constant 0 : i32
    %c0_i32_2 = arith.constant 0 : i32
    return %c0_i32, %c0_i32_0, %c0_i32_1 : i32, i32, i32
  }
  func.func @transform_4(%arg0: i32) -> (i32, i32) {
    %c0_i32 = arith.constant 0 : i32
    %c0_i32_0 = arith.constant 0 : i32
    %c0_i32_1 = arith.constant 0 : i32
    return %c0_i32, %c0_i32_0 : i32, i32
  }
  func.func @transform_5(%arg0: i32) -> (i32, i32) {
    %c0_i32 = arith.constant 0 : i32
    %c0_i32_0 = arith.constant 0 : i32
    return %arg0, %c0_i32 : i32, i32
  }
}

</mosaic_0001>

<bundles_post_ra>
// kernel: cnn_forward.2
= control target key start
LH: loop header
LB: loop body
LE: loop exit
PB: predicated region body
PF: predicated region fallthrough
CT: control target
= control target key end

     0   :  { %s1379_s12 = smov 0   ;;  %s1585_s0 = inlined_call_operand.vmem [shape: bf16[400,128], index: 0, kind: input, shape index: {}]   ;;  %s1586_s1 = inlined_call_operand.vmem [shape: bf16[128,512], index: 1, kind: input, shape index: {}]   ;;  %s1587_s2 = inlined_call_operand.vmem [shape: f32[1,128], index: 2, kind: input, shape index: {}]   ;;  %s1588_s3 = inlined_call_operand.vmem [shape: bf16[400,128], index: 3, kind: output, shape index: {}]  }
   0x1 LB: > { %s1104_s13 = sadd.s32 4294967295, %s1356_s12   ;;  %p1108_p0 = scmp.ge.s32.totalorder %s1356_s12, 1  ;;  %s1356_s12 = sphi %s1379_s12, %s13_s12  }
   0x2   : > { %p138_p1 = scmp.lt.s32.totalorder %s1356_s12, 3 }
   0x4   : > { %p139_p2 = pnand %p1108_p0, %p138_p1 }
   0x5   : > { %v1289_v0 = vld [vmem:[%s1586_s1 + $0x4] ss:$16 sps:$4 sm:$0xff] (!%p139_p2)   ;;  %v1291_v1 = vld [vmem:[%s1586_s1 + $0xc] ss:$16 sps:$4 sm:$0xff] (!%p139_p2)   ;;  %v1358_v2 = vmov (!%p139_p2), 0   ;;  %s162_s30 = smul.u32 (!%p139_p2), 25, %s1104_s13 }
   0x6   : > { %142 = sbr.rel (%p139_p2) target bundleno = 359 (0x167), region = 32  ;;  %500 = vmatprep.mubr.bf16.mxu0 (!%p139_p2), %v1358_v2  ;;  %661 = vmatprep.mubr.bf16.mxu1 (!%p139_p2), %v1358_v2  ;;  %v1293_v3 = vld [vmem:[%s1586_s1] ss:$16 sps:$4 sm:$0xff] (!%p139_p2)   ;;  %v1294_v4 = vld [vmem:[%s1586_s1 + $0x8] ss:$16 sps:$4 sm:$0xff] (!%p139_p2)  }
   0x7   : > { %468 = vmatprep.subr.bf16.mxu0 (!%p139_p2), %v1289_v0  ;;  %629 = vmatprep.subr.bf16.mxu1 (!%p139_p2), %v1291_v1  ;;  %v1295_v5 = vld [vmem:[%s1586_s1 + $0x24] ss:$16 sps:$4 sm:$0xff] (!%p139_p2)   ;;  %v1297_v6 = vld [vmem:[%s1586_s1 + $0x2c] ss:$16 sps:$4 sm:$0xff] (!%p139_p2)   ;;  %v1299_v7 = vld [vmem:[%s1586_s1 + $0x20] ss:$16 sps:$4 sm:$0xff] (!%p139_p2)  }
   0x8   : > { %469 = vmatpush1.bf16.msra.mxu0 (!%p139_p2), %v1293_v3  ;;  %630 = vmatpush1.bf16.msra.mxu1 (!%p139_p2), %v1294_v4  ;;  %v1300_v8 = vld [vmem:[%s1586_s1 + $0x28] ss:$16 sps:$4 sm:$0xff] (!%p139_p2)   ;;  %v1301_v9 = vld [vmem:[%s1586_s1 + $0x44] ss:$16 sps:$4 sm:$0xff] (!%p139_p2)   ;;  %v1303_v10 = vld [vmem:[%s1586_s1 + $0x4c] ss:$16 sps:$4 sm:$0xff] (!%p139_p2)  }
   0x9   : > { %470 = vmatprep.subr.bf16.mxu0 (!%p139_p2), %v1295_v5  ;;  %631 = vmatprep.subr.bf16.mxu1 (!%p139_p2), %v1297_v6  ;;  %v1305_v11 = vld [vmem:[%s1586_s1 + $0x40] ss:$16 sps:$4 sm:$0xff] (!%p139_p2)   ;;  %v1306_v12 = vld [vmem:[%s1586_s1 + $0x48] ss:$16 sps:$4 sm:$0xff] (!%p139_p2)   ;;  %v1307_v13 = vld [vmem:[%s1586_s1 + $0x64] ss:$16 sps:$4 sm:$0xff] (!%p139_p2)  }
   0xa   : > { %v1309_v14 = vld [vmem:[%s1586_s1 + $0x6c] ss:$16 sps:$4 sm:$0xff] (!%p139_p2)   ;;  %p163_p3 = scmp.lt.s32.totalorder (!%p139_p2), %s162_s30, 49  ;;  %v1311_v15 = vld [vmem:[%s1586_s1 + $0x60] ss:$16 sps:$4 sm:$0xff] (!%p139_p2)  }
   0xb   : > { %v1312_v16 = vld [vmem:[%s1586_s1 + $0x68] ss:$16 sps:$4 sm:$0xff] (!%p139_p2)   ;;  %v1313_v17 = vld [vmem:[%s1586_s1 + $0x84] ss:$16 sps:$4 sm:$0xff] (!%p139_p2)   ;;  %v1315_v18 = vld [vmem:[%s1586_s1 + $0x8c] ss:$16 sps:$4 sm:$0xff] (!%p139_p2)  }
   0xc   : > { %471 = vmatpush1.bf16.msra.mxu0 (!%p139_p2), %v1299_v7  ;;  %632 = vmatpush1.bf16.msra.mxu1 (!%p139_p2), %v1300_v8  ;;  %v1317_v19 = vld [vmem:[%s1586_s1 + $0x80] ss:$16 sps:$4 sm:$0xff] (!%p139_p2)   ;;  %v1318_v20 = vld [vmem:[%s1586_s1 + $0x88] ss:$16 sps:$4 sm:$0xff] (!%p139_p2)   ;;  %v1319_v21 = vld [vmem:[%s1586_s1 + $0xa4] ss:$16 sps:$4 sm:$0xff] (!%p139_p2)  }
   0xd   : > { %472 = vmatprep.subr.bf16.mxu0 %v1301_v9  ;;  %633 = vmatprep.subr.bf16.mxu1 %v1303_v10  ;;  %s1590_s30 = smov (!%p163_p3, %s162_s30), 49  ;;  %v1321_v22 = vld [vmem:[%s1586_s1 + $0xac] ss:$16 sps:$4 sm:$0xff]   ;;  %v1323_v23 = vld [vmem:[%s1586_s1 + $0xa0] ss:$16 sps:$4 sm:$0xff]  }
   0xe   : > { %s1109_s7 = sshll.u32 %s1590_s30, 2  ;;  %v1324_v24 = vld [vmem:[%s1586_s1 + $0xa8] ss:$16 sps:$4 sm:$0xff]   ;;  %v1325_v25 = vld [vmem:[%s1586_s1 + $0xc4] ss:$16 sps:$4 sm:$0xff]  }
   0xf   : > { %s1472_s17 = scalar_lea.vmem %s1585_s0, %s1109_s7  ;;  %v1327_v26 = vld [vmem:[%s1586_s1 + $0xcc] ss:$16 sps:$4 sm:$0xff]   ;;  %v1329_v27 = vld [vmem:[%s1586_s1 + $0xc0] ss:$16 sps:$4 sm:$0xff]   ;;  %v1330_v28 = vld [vmem:[%s1586_s1 + $0xc8] ss:$16 sps:$4 sm:$0xff]   ;;  %s1544_s11 = scalar_lea.vmem %s1588_s3, %s1109_s7 }
  0x10   : > { %473 = vmatpush1.bf16.msra.mxu0 %v1305_v11  ;;  %634 = vmatpush1.bf16.msra.mxu1 %v1306_v12  ;;  %v1331_v29 = vld [vmem:[%s1586_s1 + $0xe4] ss:$16 sps:$4 sm:$0xff]   ;;  %v1333_v30 = vld [vmem:[%s1586_s1 + $0xec] ss:$16 sps:$4 sm:$0xff]   ;;  %v1335_v31 = vld [vmem:[%s1586_s1 + $0xe0] ss:$16 sps:$4 sm:$0xff]  }
  0x11   : > { %474 = vmatprep.subr.bf16.mxu0 %v1307_v13  ;;  %635 = vmatprep.subr.bf16.mxu1 %v1309_v14  ;;  %v1336_v32 = vld [vmem:[%s1586_s1 + $0xe8] ss:$16 sps:$4 sm:$0xff]   ;;  %v1337_v33 = vld [vmem:[%s1472_s17] sm:$0xff]   ;;  %v1339_v35 = vld [vmem:[%s1472_s17 + $0x10] sm:$0xff]  }
  0x12   : > { %v1338_v34 = vld [vmem:[%s1472_s17 + $0x8] sm:$0xff]   ;;  %v1340_v36 = vld [vmem:[%s1472_s17 + $0x18] sm:$0xff]   ;;  %v1341_v37 = vld [vmem:[%s1472_s17 + $0x20] sm:$0xff]  }
  0x13   : > { %v1342_v38 = vld [vmem:[%s1472_s17 + $0x28] sm:$0xff]   ;;  %v1343_v39 = vld [vmem:[%s1472_s17 + $0x30] sm:$0xff]   ;;  %v1344_v40 = vld [vmem:[%s1472_s17 + $0x38] sm:$0xff]  }
  0x14   : > { %475 = vmatpush1.bf16.msra.mxu0 %v1311_v15  ;;  %636 = vmatpush1.bf16.msra.mxu1 %v1312_v16  ;;  %v1345_v41 = vld [vmem:[%s1472_s17 + $0x40] sm:$0xff]   ;;  %v1346_v42 = vld [vmem:[%s1472_s17 + $0x48] sm:$0xff]   ;;  %v1347_v43 = vld [vmem:[%s1472_s17 + $0x50] sm:$0xff]  }
  0x15   : > { %476 = vmatprep.subr.bf16.mxu0 %v1313_v17  ;;  %637 = vmatprep.subr.bf16.mxu1 %v1315_v18  ;;  %v1348_v44 = vld [vmem:[%s1472_s17 + $0x58] sm:$0xff]   ;;  %v1349_v45 = vld [vmem:[%s1472_s17 + $0x60] ss:$0 sps:$4 sm:$0xff]  }
  0x16   : > { %v1535_v54 = vld [vmem:[%s1587_s2] ss:$0 sm:$0xff] }
  0x18   : > { %477 = vmatpush1.bf16.msra.mxu0 %v1317_v19  ;;  %638 = vmatpush1.bf16.msra.mxu1 %v1318_v20 }
  0x19   : > { %478 = vmatprep.subr.bf16.mxu0 %v1319_v21  ;;  %639 = vmatprep.subr.bf16.mxu1 %v1321_v22 }
  0x1c   : > { %479 = vmatpush1.bf16.msra.mxu0 %v1323_v23  ;;  %640 = vmatpush1.bf16.msra.mxu1 %v1324_v24 }
  0x1d   : > { %480 = vmatprep.subr.bf16.mxu0 %v1325_v25  ;;  %641 = vmatprep.subr.bf16.mxu1 %v1327_v26 }
  0x20   : > { %481 = vmatpush1.bf16.msra.mxu0 %v1329_v27  ;;  %642 = vmatpush1.bf16.msra.mxu1 %v1330_v28 }
  0x21   : > { %482 = vmatprep.subr.bf16.mxu0 %v1331_v29  ;;  %643 = vmatprep.subr.bf16.mxu1 %v1333_v30 }
  0x24   : > { %483 = vmatpush1.bf16.msra.mxu0 %v1335_v31  ;;  %644 = vmatpush1.bf16.msra.mxu1 %v1336_v32 }
  0x27   : > { %501 = vmatmul.mubr.bf16.vlgmr.msra.gmra.mrb[0].mxu0 %v1337_v33  ;;  %662 = vmatmul.mubr.bf16.vlgmr.msra.gmra.mrb[0].mxu1 %v1337_v33 }
  0x28   : > { %510 = vmatprep.mubr.bf16.mxu0 %v1358_v2  ;;  %671 = vmatprep.mubr.bf16.mxu1 %v1358_v2 }
  0x2f   : > { %511 = vmatmul.mubr.bf16.gmra.mrb[4].mxu0 %v1338_v34  ;;  %672 = vmatmul.mubr.bf16.gmra.mrb[4].mxu1 %v1338_v34 }
  0x30   : > { %520 = vmatprep.mubr.bf16.mxu0 %v1358_v2  ;;  %681 = vmatprep.mubr.bf16.mxu1 %v1358_v2 }
  0x37   : > { %521 = vmatmul.mubr.bf16.gmra.mrb[8].mxu0 %v1339_v35  ;;  %682 = vmatmul.mubr.bf16.gmra.mrb[8].mxu1 %v1339_v35 }
  0x38   : > { %530 = vmatprep.mubr.bf16.mxu0 %v1358_v2  ;;  %691 = vmatprep.mubr.bf16.mxu1 %v1358_v2 }
  0x3f   : > { %531 = vmatmul.mubr.bf16.gmra.mrb[12].mxu0 %v1340_v36  ;;  %692 = vmatmul.mubr.bf16.gmra.mrb[12].mxu1 %v1340_v36 }
  0x40   : > { %540 = vmatprep.mubr.bf16.mxu0 %v1358_v2  ;;  %701 = vmatprep.mubr.bf16.mxu1 %v1358_v2 }
  0x47   : > { %541 = vmatmul.mubr.bf16.gmra.mrb[16].mxu0 %v1341_v37  ;;  %702 = vmatmul.mubr.bf16.gmra.mrb[16].mxu1 %v1341_v37 }
  0x48   : > { %550 = vmatprep.mubr.bf16.mxu0 %v1358_v2  ;;  %711 = vmatprep.mubr.bf16.mxu1 %v1358_v2 }
  0x4f   : > { %551 = vmatmul.mubr.bf16.gmra.mrb[20].mxu0 %v1342_v38  ;;  %712 = vmatmul.mubr.bf16.gmra.mrb[20].mxu1 %v1342_v38 }
  0x50   : > { %560 = vmatprep.mubr.bf16.mxu0 %v1358_v2  ;;  %721 = vmatprep.mubr.bf16.mxu1 %v1358_v2 }
  0x57   : > { %561 = vmatmul.mubr.bf16.gmra.mrb[24].mxu0 %v1343_v39  ;;  %722 = vmatmul.mubr.bf16.gmra.mrb[24].mxu1 %v1343_v39 }
  0x58   : > { %570 = vmatprep.mubr.bf16.mxu0 %v1358_v2  ;;  %731 = vmatprep.mubr.bf16.mxu1 %v1358_v2 }
  0x5f   : > { %571 = vmatmul.mubr.bf16.gmra.mrb[28].mxu0 %v1344_v40  ;;  %732 = vmatmul.mubr.bf16.gmra.mrb[28].mxu1 %v1344_v40 }
  0x60   : > { %580 = vmatprep.mubr.bf16.mxu0 %v1358_v2  ;;  %741 = vmatprep.mubr.bf16.mxu1 %v1358_v2 }
  0x67   : > { %581 = vmatmul.mubr.bf16.gmra.mrb[32].mxu0 %v1345_v41  ;;  %742 = vmatmul.mubr.bf16.gmra.mrb[32].mxu1 %v1345_v41 }
  0x68   : > { %590 = vmatprep.mubr.bf16.mxu0 %v1358_v2  ;;  %751 = vmatprep.mubr.bf16.mxu1 %v1358_v2 }
  0x6f   : > { %591 = vmatmul.mubr.bf16.gmra.mrb[36].mxu0 %v1346_v42  ;;  %752 = vmatmul.mubr.bf16.gmra.mrb[36].mxu1 %v1346_v42 }
  0x70   : > { %600 = vmatprep.mubr.bf16.mxu0 %v1358_v2  ;;  %761 = vmatprep.mubr.bf16.mxu1 %v1358_v2 }
  0x77   : > { %601 = vmatmul.mubr.bf16.gmra.mrb[40].mxu0 %v1347_v43  ;;  %762 = vmatmul.mubr.bf16.gmra.mrb[40].mxu1 %v1347_v43 }
  0x78   : > { %610 = vmatprep.mubr.bf16.mxu0 %v1358_v2  ;;  %771 = vmatprep.mubr.bf16.mxu1 %v1358_v2 }
  0x7f   : > { %611 = vmatmul.mubr.bf16.gmra.mrb[44].mxu0 %v1348_v44  ;;  %772 = vmatmul.mubr.bf16.gmra.mrb[44].mxu1 %v1348_v44 }
  0x80   : > { %620 = vmatprep.mubr.bf16.mxu0 %v1358_v2  ;;  %781 = vmatprep.mubr.bf16.mxu1 %v1358_v2 }
  0x87   : > { %621 = vmatmul.mubr.bf16.gmra.mrb[48].mxu0 %v1349_v45  ;;  %782 = vmatmul.mubr.bf16.gmra.mrb[48].mxu1 %v1349_v45 }
  0xfa   : > { %v502_v46 = vpop.f32.mrb[0].mxu0  ;;  %v663_v47 = vpop.f32.mrb[0].mxu1 }
  0xfb   : > { %v504_v48 = vpop.f32.mrb[1].mxu0  ;;  %v665_v49 = vpop.f32.mrb[1].mxu1 }
  0xfc   : > { %v790_v50 = vmax.f32 %v502_v46, %v504_v48  ;;  %v815_v51 = vmax.f32 %v663_v47, %v665_v49  ;;  %v506_v52 = vpop.f32.mrb[2].mxu0  ;;  %v667_v53 = vpop.f32.mrb[2].mxu1 }
  0xfd   : > { %v508_v55 = vpop.f32.mrb[3].mxu0  ;;  %v669_v56 = vpop.f32.mrb[3].mxu1 }
  0xfe   : > { %v840_v57 = vmax.f32 %v790_v50, %v815_v51  ;;  %v791_v58 = vmax.f32 %v506_v52, %v508_v55  ;;  %v816_v59 = vmax.f32 %v667_v53, %v669_v56 }
 0x100   : > { %v872_v60 = vadd.f32 %v1535_v54, %v840_v57  ;;  %v841_v61 = vmax.f32 %v791_v58, %v816_v59 }
 0x102   : > { %v873_v62 = vadd.f32 %v1535_v54, %v841_v61  ;;  %v512_v63 = vpop.f32.mrb[4].mxu0  ;;  %v673_v0 = vpop.f32.mrb[4].mxu1  ;;  %v897_v3 = vmax.f32 %v872_v60, 0.0 }
 0x103   : > { %v514_v1 = vpop.f32.mrb[5].mxu0  ;;  %v675_v2 = vpop.f32.mrb[5].mxu1 }
 0x104   : > { %v898_v4 = vmax.f32 %v873_v62, 0.0  ;;  %v792_v5 = vmax.f32 %v512_v63, %v514_v1  ;;  %v817_v6 = vmax.f32 %v673_v0, %v675_v2  ;;  %v516_v7 = vpop.f32.mrb[6].mxu0  ;;  %v677_v8 = vpop.f32.mrb[6].mxu1 }
 0x105   : > { %v518_v9 = vpop.f32.mrb[7].mxu0  ;;  %v679_v10 = vpop.f32.mrb[7].mxu1 }
 0x106   : > { %v1212_v11 = vpack.c.bf16 %v898_v4, %v897_v3  ;;  %v842_v12 = vmax.f32 %v792_v5, %v817_v6  ;;  %v793_v13 = vmax.f32 %v516_v7, %v518_v9  ;;  %v818_v14 = vmax.f32 %v677_v8, %v679_v10 }
 0x108   : > { %1213 = vst [vmem:[%s1544_s11] sm:$0xff] %v1212_v11   ;;  %v874_v15 = vadd.f32 %v1535_v54, %v842_v12  ;;  %v843_v16 = vmax.f32 %v793_v13, %v818_v14 }
 0x10a   : > { %v875_v17 = vadd.f32 %v1535_v54, %v843_v16  ;;  %v522_v18 = vpop.f32.mrb[8].mxu0  ;;  %v683_v19 = vpop.f32.mrb[8].mxu1  ;;  %v899_v22 = vmax.f32 %v874_v15, 0.0 }
 0x10b   : > { %v524_v20 = vpop.f32.mrb[9].mxu0  ;;  %v685_v21 = vpop.f32.mrb[9].mxu1 }
 0x10c   : > { %v900_v23 = vmax.f32 %v875_v17, 0.0  ;;  %v794_v24 = vmax.f32 %v522_v18, %v524_v20  ;;  %v819_v25 = vmax.f32 %v683_v19, %v685_v21  ;;  %v526_v26 = vpop.f32.mrb[10].mxu0  ;;  %v687_v27 = vpop.f32.mrb[10].mxu1 }
 0x10d   : > { %v528_v28 = vpop.f32.mrb[11].mxu0  ;;  %v689_v29 = vpop.f32.mrb[11].mxu1 }
 0x10e   : > { %v1217_v30 = vpack.c.bf16 %v900_v23, %v899_v22  ;;  %v844_v31 = vmax.f32 %v794_v24, %v819_v25  ;;  %v795_v32 = vmax.f32 %v526_v26, %v528_v28  ;;  %v820_v33 = vmax.f32 %v687_v27, %v689_v29 }
 0x110   : > { %1269 = vst [vmem:[%s1544_s11 + $0x8] sm:$0xff] %v1217_v30   ;;  %v876_v34 = vadd.f32 %v1535_v54, %v844_v31  ;;  %v845_v35 = vmax.f32 %v795_v32, %v820_v33 }
 0x112   : > { %v877_v36 = vadd.f32 %v1535_v54, %v845_v35  ;;  %v532_v37 = vpop.f32.mrb[12].mxu0  ;;  %v693_v38 = vpop.f32.mrb[12].mxu1  ;;  %v901_v41 = vmax.f32 %v876_v34, 0.0 }
 0x113   : > { %v534_v39 = vpop.f32.mrb[13].mxu0  ;;  %v695_v40 = vpop.f32.mrb[13].mxu1 }
 0x114   : > { %v902_v42 = vmax.f32 %v877_v36, 0.0  ;;  %v796_v43 = vmax.f32 %v532_v37, %v534_v39  ;;  %v821_v44 = vmax.f32 %v693_v38, %v695_v40  ;;  %v536_v45 = vpop.f32.mrb[14].mxu0  ;;  %v697_v46 = vpop.f32.mrb[14].mxu1 }
 0x115   : > { %v538_v47 = vpop.f32.mrb[15].mxu0  ;;  %v699_v48 = vpop.f32.mrb[15].mxu1 }
 0x116   : > { %v1222_v49 = vpack.c.bf16 %v902_v42, %v901_v41  ;;  %v846_v50 = vmax.f32 %v796_v43, %v821_v44  ;;  %v797_v51 = vmax.f32 %v536_v45, %v538_v47  ;;  %v822_v52 = vmax.f32 %v697_v46, %v699_v48 }
 0x118   : > { %1270 = vst [vmem:[%s1544_s11 + $0x10] sm:$0xff] %v1222_v49   ;;  %v878_v53 = vadd.f32 %v1535_v54, %v846_v50  ;;  %v847_v55 = vmax.f32 %v797_v51, %v822_v52 }
 0x11a   : > { %v879_v56 = vadd.f32 %v1535_v54, %v847_v55  ;;  %v542_v57 = vpop.f32.mrb[16].mxu0  ;;  %v703_v58 = vpop.f32.mrb[16].mxu1  ;;  %v903_v61 = vmax.f32 %v878_v53, 0.0 }
 0x11b   : > { %v544_v59 = vpop.f32.mrb[17].mxu0  ;;  %v705_v60 = vpop.f32.mrb[17].mxu1 }
 0x11c   : > { %v904_v62 = vmax.f32 %v879_v56, 0.0  ;;  %v798_v63 = vmax.f32 %v542_v57, %v544_v59  ;;  %v823_v0 = vmax.f32 %v703_v58, %v705_v60  ;;  %v546_v1 = vpop.f32.mrb[18].mxu0  ;;  %v707_v2 = vpop.f32.mrb[18].mxu1 }
 0x11d   : > { %v548_v3 = vpop.f32.mrb[19].mxu0  ;;  %v709_v4 = vpop.f32.mrb[19].mxu1 }
 0x11e   : > { %v1227_v5 = vpack.c.bf16 %v904_v62, %v903_v61  ;;  %v848_v6 = vmax.f32 %v798_v63, %v823_v0  ;;  %v799_v7 = vmax.f32 %v546_v1, %v548_v3  ;;  %v824_v8 = vmax.f32 %v707_v2, %v709_v4 }
 0x120   : > { %1271 = vst [vmem:[%s1544_s11 + $0x18] sm:$0xff] %v1227_v5   ;;  %v880_v9 = vadd.f32 %v1535_v54, %v848_v6  ;;  %v849_v10 = vmax.f32 %v799_v7, %v824_v8 }
 0x122   : > { %v881_v11 = vadd.f32 %v1535_v54, %v849_v10  ;;  %v552_v12 = vpop.f32.mrb[20].mxu0  ;;  %v713_v13 = vpop.f32.mrb[20].mxu1  ;;  %v905_v16 = vmax.f32 %v880_v9, 0.0 }
 0x123   : > { %v554_v14 = vpop.f32.mrb[21].mxu0  ;;  %v715_v15 = vpop.f32.mrb[21].mxu1 }
 0x124   : > { %v906_v17 = vmax.f32 %v881_v11, 0.0  ;;  %v800_v18 = vmax.f32 %v552_v12, %v554_v14  ;;  %v825_v19 = vmax.f32 %v713_v13, %v715_v15  ;;  %v556_v20 = vpop.f32.mrb[22].mxu0  ;;  %v717_v21 = vpop.f32.mrb[22].mxu1 }
 0x125   : > { %v558_v22 = vpop.f32.mrb[23].mxu0  ;;  %v719_v23 = vpop.f32.mrb[23].mxu1 }
 0x126   : > { %v1232_v24 = vpack.c.bf16 %v906_v17, %v905_v16  ;;  %v850_v25 = vmax.f32 %v800_v18, %v825_v19  ;;  %v801_v26 = vmax.f32 %v556_v20, %v558_v22  ;;  %v826_v27 = vmax.f32 %v717_v21, %v719_v23 }
 0x128   : > { %1272 = vst [vmem:[%s1544_s11 + $0x20] sm:$0xff] %v1232_v24   ;;  %v882_v28 = vadd.f32 %v1535_v54, %v850_v25  ;;  %v851_v29 = vmax.f32 %v801_v26, %v826_v27 }
 0x12a   : > { %v883_v30 = vadd.f32 %v1535_v54, %v851_v29  ;;  %v562_v31 = vpop.f32.mrb[24].mxu0  ;;  %v723_v32 = vpop.f32.mrb[24].mxu1  ;;  %v907_v35 = vmax.f32 %v882_v28, 0.0 }
 0x12b   : > { %v564_v33 = vpop.f32.mrb[25].mxu0  ;;  %v725_v34 = vpop.f32.mrb[25].mxu1 }
 0x12c   : > { %v908_v36 = vmax.f32 %v883_v30, 0.0  ;;  %v802_v37 = vmax.f32 %v562_v31, %v564_v33  ;;  %v827_v38 = vmax.f32 %v723_v32, %v725_v34  ;;  %v566_v39 = vpop.f32.mrb[26].mxu0  ;;  %v727_v40 = vpop.f32.mrb[26].mxu1 }
 0x12d   : > { %v568_v41 = vpop.f32.mrb[27].mxu0  ;;  %v729_v42 = vpop.f32.mrb[27].mxu1 }
 0x12e   : > { %v1237_v43 = vpack.c.bf16 %v908_v36, %v907_v35  ;;  %v852_v44 = vmax.f32 %v802_v37, %v827_v38  ;;  %v803_v45 = vmax.f32 %v566_v39, %v568_v41  ;;  %v828_v46 = vmax.f32 %v727_v40, %v729_v42 }
 0x130   : > { %1273 = vst [vmem:[%s1544_s11 + $0x28] sm:$0xff] %v1237_v43   ;;  %v884_v47 = vadd.f32 %v1535_v54, %v852_v44  ;;  %v853_v48 = vmax.f32 %v803_v45, %v828_v46 }
 0x132   : > { %v885_v49 = vadd.f32 %v1535_v54, %v853_v48  ;;  %v572_v50 = vpop.f32.mrb[28].mxu0  ;;  %v733_v51 = vpop.f32.mrb[28].mxu1  ;;  %v909_v55 = vmax.f32 %v884_v47, 0.0 }
 0x133   : > { %v574_v52 = vpop.f32.mrb[29].mxu0  ;;  %v735_v53 = vpop.f32.mrb[29].mxu1 }
 0x134   : > { %v910_v56 = vmax.f32 %v885_v49, 0.0  ;;  %v804_v57 = vmax.f32 %v572_v50, %v574_v52  ;;  %v829_v58 = vmax.f32 %v733_v51, %v735_v53  ;;  %v576_v59 = vpop.f32.mrb[30].mxu0  ;;  %v737_v60 = vpop.f32.mrb[30].mxu1 }
 0x135   : > { %v578_v61 = vpop.f32.mrb[31].mxu0  ;;  %v739_v62 = vpop.f32.mrb[31].mxu1 }
 0x136   : > { %v1242_v63 = vpack.c.bf16 %v910_v56, %v909_v55  ;;  %v854_v0 = vmax.f32 %v804_v57, %v829_v58  ;;  %v805_v1 = vmax.f32 %v576_v59, %v578_v61  ;;  %v830_v2 = vmax.f32 %v737_v60, %v739_v62 }
 0x138   : > { %1274 = vst [vmem:[%s1544_s11 + $0x30] sm:$0xff] %v1242_v63   ;;  %v886_v3 = vadd.f32 %v1535_v54, %v854_v0  ;;  %v855_v4 = vmax.f32 %v805_v1, %v830_v2 }
 0x13a   : > { %v887_v5 = vadd.f32 %v1535_v54, %v855_v4  ;;  %v582_v6 = vpop.f32.mrb[32].mxu0  ;;  %v743_v7 = vpop.f32.mrb[32].mxu1  ;;  %v911_v10 = vmax.f32 %v886_v3, 0.0 }
 0x13b   : > { %v584_v8 = vpop.f32.mrb[33].mxu0  ;;  %v745_v9 = vpop.f32.mrb[33].mxu1 }
 0x13c   : > { %v912_v11 = vmax.f32 %v887_v5, 0.0  ;;  %v806_v12 = vmax.f32 %v582_v6, %v584_v8  ;;  %v831_v13 = vmax.f32 %v743_v7, %v745_v9  ;;  %v586_v14 = vpop.f32.mrb[34].mxu0  ;;  %v747_v15 = vpop.f32.mrb[34].mxu1 }
 0x13d   : > { %v588_v16 = vpop.f32.mrb[35].mxu0  ;;  %v749_v17 = vpop.f32.mrb[35].mxu1 }
 0x13e   : > { %v1247_v18 = vpack.c.bf16 %v912_v11, %v911_v10  ;;  %v856_v19 = vmax.f32 %v806_v12, %v831_v13  ;;  %v807_v20 = vmax.f32 %v586_v14, %v588_v16  ;;  %v832_v21 = vmax.f32 %v747_v15, %v749_v17 }
 0x140   : > { %1275 = vst [vmem:[%s1544_s11 + $0x38] sm:$0xff] %v1247_v18   ;;  %v888_v22 = vadd.f32 %v1535_v54, %v856_v19  ;;  %v857_v23 = vmax.f32 %v807_v20, %v832_v21 }
 0x142   : > { %v889_v24 = vadd.f32 %v1535_v54, %v857_v23  ;;  %v592_v25 = vpop.f32.mrb[36].mxu0  ;;  %v753_v26 = vpop.f32.mrb[36].mxu1  ;;  %v913_v29 = vmax.f32 %v888_v22, 0.0 }
 0x143   : > { %v594_v27 = vpop.f32.mrb[37].mxu0  ;;  %v755_v28 = vpop.f32.mrb[37].mxu1 }
 0x144   : > { %v914_v30 = vmax.f32 %v889_v24, 0.0  ;;  %v808_v31 = vmax.f32 %v592_v25, %v594_v27  ;;  %v833_v32 = vmax.f32 %v753_v26, %v755_v28  ;;  %v596_v33 = vpop.f32.mrb[38].mxu0  ;;  %v757_v34 = vpop.f32.mrb[38].mxu1 }
 0x145   : > { %v598_v35 = vpop.f32.mrb[39].mxu0  ;;  %v759_v36 = vpop.f32.mrb[39].mxu1 }
 0x146   : > { %v1252_v37 = vpack.c.bf16 %v914_v30, %v913_v29  ;;  %v858_v38 = vmax.f32 %v808_v31, %v833_v32  ;;  %v809_v39 = vmax.f32 %v596_v33, %v598_v35  ;;  %v834_v40 = vmax.f32 %v757_v34, %v759_v36 }
 0x148   : > { %1276 = vst [vmem:[%s1544_s11 + $0x40] sm:$0xff] %v1252_v37   ;;  %v890_v41 = vadd.f32 %v1535_v54, %v858_v38  ;;  %v859_v42 = vmax.f32 %v809_v39, %v834_v40 }
 0x14a   : > { %v891_v43 = vadd.f32 %v1535_v54, %v859_v42  ;;  %v602_v44 = vpop.f32.mrb[40].mxu0  ;;  %v763_v45 = vpop.f32.mrb[40].mxu1  ;;  %v915_v48 = vmax.f32 %v890_v41, 0.0 }
 0x14b   : > { %v604_v46 = vpop.f32.mrb[41].mxu0  ;;  %v765_v47 = vpop.f32.mrb[41].mxu1 }
 0x14c   : > { %v916_v49 = vmax.f32 %v891_v43, 0.0  ;;  %v810_v50 = vmax.f32 %v602_v44, %v604_v46  ;;  %v835_v51 = vmax.f32 %v763_v45, %v765_v47  ;;  %v606_v52 = vpop.f32.mrb[42].mxu0  ;;  %v767_v53 = vpop.f32.mrb[42].mxu1 }
 0x14d   : > { %v608_v55 = vpop.f32.mrb[43].mxu0  ;;  %v769_v56 = vpop.f32.mrb[43].mxu1 }
 0x14e   : > { %v1257_v57 = vpack.c.bf16 %v916_v49, %v915_v48  ;;  %v860_v58 = vmax.f32 %v810_v50, %v835_v51  ;;  %v811_v59 = vmax.f32 %v606_v52, %v608_v55  ;;  %v836_v60 = vmax.f32 %v767_v53, %v769_v56 }
 0x150   : > { %1277 = vst [vmem:[%s1544_s11 + $0x48] sm:$0xff] %v1257_v57   ;;  %v892_v61 = vadd.f32 %v1535_v54, %v860_v58  ;;  %v861_v62 = vmax.f32 %v811_v59, %v836_v60 }
 0x152   : > { %v893_v63 = vadd.f32 %v1535_v54, %v861_v62  ;;  %v612_v0 = vpop.f32.mrb[44].mxu0  ;;  %v773_v1 = vpop.f32.mrb[44].mxu1  ;;  %v917_v4 = vmax.f32 %v892_v61, 0.0 }
 0x153   : > { %v614_v2 = vpop.f32.mrb[45].mxu0  ;;  %v775_v3 = vpop.f32.mrb[45].mxu1 }
 0x154   : > { %v918_v5 = vmax.f32 %v893_v63, 0.0  ;;  %v812_v6 = vmax.f32 %v612_v0, %v614_v2  ;;  %v837_v7 = vmax.f32 %v773_v1, %v775_v3  ;;  %v616_v8 = vpop.f32.mrb[46].mxu0  ;;  %v777_v9 = vpop.f32.mrb[46].mxu1 }
 0x155   : > { %v618_v10 = vpop.f32.mrb[47].mxu0  ;;  %v779_v11 = vpop.f32.mrb[47].mxu1 }
 0x156   : > { %v1262_v12 = vpack.c.bf16 %v918_v5, %v917_v4  ;;  %v862_v13 = vmax.f32 %v812_v6, %v837_v7  ;;  %v813_v14 = vmax.f32 %v616_v8, %v618_v10  ;;  %v838_v15 = vmax.f32 %v777_v9, %v779_v11 }
 0x158   : > { %1278 = vst [vmem:[%s1544_s11 + $0x50] sm:$0xff] %v1262_v12   ;;  %v894_v16 = vadd.f32 %v1535_v54, %v862_v13  ;;  %v863_v17 = vmax.f32 %v813_v14, %v838_v15 }
 0x15a   : > { %v895_v18 = vadd.f32 %v1535_v54, %v863_v17  ;;  %v622_v19 = vpop.f32.mrb[48].mxu0  ;;  %v783_v20 = vpop.f32.mrb[48].mxu1  ;;  %v919_v23 = vmax.f32 %v894_v16, 0.0 }
 0x15b   : > { %v624_v21 = vpop.f32.mrb[49].mxu0  ;;  %v785_v22 = vpop.f32.mrb[49].mxu1 }
 0x15c   : > { %v920_v24 = vmax.f32 %v895_v18, 0.0  ;;  %v814_v25 = vmax.f32 %v622_v19, %v624_v21  ;;  %v839_v26 = vmax.f32 %v783_v20, %v785_v22  ;;  %v626_v27 = vpop.f32.mrb[50].mxu0  ;;  %v787_v28 = vpop.f32.mrb[50].mxu1 }
 0x15d   : > { %v627_v29 = vpop.f32.mrb[51].mxu0  ;;  %v788_v30 = vpop.f32.mrb[51].mxu1 }
 0x15e   : > { %v1267_v31 = vpack.c.bf16 %v920_v24, %v919_v23  ;;  %v864_v32 = vmax.f32 %v814_v25, %v839_v26 }
 0x160   : > { %1279 = vst [vmem:[%s1544_s11 + $0x58] sm:$0xff] %v1267_v31   ;;  %v896_v33 = vadd.f32 %v1535_v54, %v864_v32 }
 0x162   : > { %v921_v34 = vmax.f32 %v896_v33, 0.0 }
 0x164   : > { %v1208_v35 = vpack.c.bf16 %v921_v34, %v921_v34 }
 0x166   : > { %1047 = vst [vmem:[%s1544_s11 + $0x60] sm:$0xf] %v1208_v35 }
 0x167 PF: > { %s13_s12 = sadd.s32 1, %s1356_s12  }
 0x168   : > { %p10_p4 = scmp.ge.s32.totalorder %s13_s12, 4  }
 0x16a   :  { %12 = sbr.rel (!%p10_p4) target bundleno = 1 (0x1), region = 62 }

// kernel: cnn_forward.3
= control target key start
LH: loop header
LB: loop body
LE: loop exit
PB: predicated region body
PF: predicated region fallthrough
CT: control target
= control target key end

     0   :  { %10 = vsyncpa [#allocation3], 0  ;;  %v1402_v51 = vmov 0.0   ;;  %s1404_s20 = smov 0   ;;  %s1720_s0 = inlined_call_operand.vmem [shape: bf16[4,49,2,400], index: 0, kind: input, shape index: {}]   ;;  %s1721_s1 = inlined_call_operand.vmem [shape: bf16[400,128], index: 1, kind: input, shape index: {}]   ;;  %s1722_s2 = inlined_call_operand.vmem [shape: f32[1,128], index: 2, kind: input, shape index: {}]   ;;  %s1723_s3 = inlined_call_operand.vmem [shape: bf16[49,128,128], index: 3, kind: input, shape index: {}]   ;;  %s1724_s4 = inlined_call_operand.vmem [shape: f32[1,128], index: 4, kind: input, shape index: {}]   ;;  %s1725_s5 = inlined_call_operand.hbm [shape: f32[2,128], index: 5, kind: output, shape index: {}]  }
   0x1   :  { %v1150_v0 = vld [vmem:[%s1721_s1] sm:$0xf]  ;;  %v1155_v1 = vld [vmem:[%s1721_s1 + $0x4] sm:$0xf]  ;;  %v1160_v2 = vld [vmem:[%s1721_s1 + $0x8] sm:$0xf] }
   0x2   :  { %1729 = vst [vmem:[#allocation5_spill] sm:$0xff] %v1150_v0  ;;  %1730 = vst [vmem:[#allocation6_spill] sm:$0xff] %v1155_v1  ;;  %v1165_v3 = vld [vmem:[%s1721_s1 + $0xc] sm:$0xf]  ;;  %v1170_v4 = vld [vmem:[%s1721_s1 + $0x10] sm:$0xf] }
   0x3   :  { %1731 = vst [vmem:[#allocation7_spill] sm:$0xff] %v1160_v2  ;;  %1732 = vst [vmem:[#allocation8_spill] sm:$0xff] %v1165_v3  ;;  %v1175_v5 = vld [vmem:[%s1721_s1 + $0x14] sm:$0xf]  ;;  %v1180_v6 = vld [vmem:[%s1721_s1 + $0x18] sm:$0xf] }
   0x4   :  { %1733 = vst [vmem:[#allocation9_spill] sm:$0xff] %v1170_v4  ;;  %1734 = vst [vmem:[#allocation10_spill] sm:$0xff] %v1175_v5  ;;  %v1185_v7 = vld [vmem:[%s1721_s1 + $0x1c] sm:$0xf]  ;;  %v1190_v8 = vld [vmem:[%s1721_s1 + $0x20] sm:$0xf] }
   0x5   :  { %1735 = vst [vmem:[#allocation11_spill] sm:$0xff] %v1180_v6  ;;  %1736 = vst [vmem:[#allocation12_spill] sm:$0xff] %v1185_v7  ;;  %v1195_v9 = vld [vmem:[%s1721_s1 + $0x24] sm:$0xf]  ;;  %v1200_v10 = vld [vmem:[%s1721_s1 + $0x28] sm:$0xf] }
   0x6   :  { %1737 = vst [vmem:[#allocation13_spill] sm:$0xff] %v1190_v8  ;;  %1738 = vst [vmem:[#allocation14_spill] sm:$0xff] %v1195_v9  ;;  %v1205_v11 = vld [vmem:[%s1721_s1 + $0x2c] sm:$0xf]  ;;  %v1210_v12 = vld [vmem:[%s1721_s1 + $0x30] sm:$0xf] }
   0x7   :  { %1739 = vst [vmem:[#allocation15_spill] sm:$0xff] %v1200_v10  ;;  %1740 = vst [vmem:[#allocation16_spill] sm:$0xff] %v1205_v11  ;;  %v1215_v13 = vld [vmem:[%s1721_s1 + $0x34] sm:$0xf]  ;;  %v1220_v14 = vld [vmem:[%s1721_s1 + $0x38] sm:$0xf] }
   0x8   :  { %1741 = vst [vmem:[#allocation17_spill] sm:$0xff] %v1210_v12  ;;  %1742 = vst [vmem:[#allocation18_spill] sm:$0xff] %v1215_v13  ;;  %v1225_v15 = vld [vmem:[%s1721_s1 + $0x3c] sm:$0xf]  ;;  %v1230_v16 = vld [vmem:[%s1721_s1 + $0x40] sm:$0xf] }
   0x9   :  { %1743 = vst [vmem:[#allocation19_spill] sm:$0xff] %v1220_v14  ;;  %1744 = vst [vmem:[#allocation20_spill] sm:$0xff] %v1225_v15  ;;  %v1235_v17 = vld [vmem:[%s1721_s1 + $0x44] sm:$0xf]  ;;  %v1240_v18 = vld [vmem:[%s1721_s1 + $0x48] sm:$0xf] }
   0xa   :  { %1745 = vst [vmem:[#allocation21_spill] sm:$0xff] %v1230_v16  ;;  %1746 = vst [vmem:[#allocation22_spill] sm:$0xff] %v1235_v17  ;;  %v1245_v19 = vld [vmem:[%s1721_s1 + $0x4c] sm:$0xf]  ;;  %v1250_v20 = vld [vmem:[%s1721_s1 + $0x50] sm:$0xf] }
   0xb   :  { %1747 = vst [vmem:[#allocation23_spill] sm:$0xff] %v1240_v18  ;;  %1748 = vst [vmem:[#allocation24_spill] sm:$0xff] %v1245_v19  ;;  %v1255_v21 = vld [vmem:[%s1721_s1 + $0x54] sm:$0xf]  ;;  %v1260_v22 = vld [vmem:[%s1721_s1 + $0x58] sm:$0xf] }
   0xc   :  { %1749 = vst [vmem:[#allocation25_spill] sm:$0xff] %v1250_v20  ;;  %1750 = vst [vmem:[#allocation26_spill] sm:$0xff] %v1255_v21  ;;  %v1265_v23 = vld [vmem:[%s1721_s1 + $0x5c] sm:$0xf]  ;;  %v1270_v24 = vld [vmem:[%s1721_s1 + $0x60] sm:$0xf] }
   0xd   :  { %1751 = vst [vmem:[#allocation27_spill] sm:$0xff] %v1260_v22  ;;  %1752 = vst [vmem:[#allocation28_spill] sm:$0xff] %v1265_v23  ;;  %v1275_v25 = vld [vmem:[%s1721_s1 + $0x64] sm:$0xf]  ;;  %v1280_v26 = vld [vmem:[%s1721_s1 + $0x68] sm:$0xf] }
   0xe   :  { %v1285_v27 = vld [vmem:[%s1721_s1 + $0x6c] sm:$0xf]  ;;  %v1290_v28 = vld [vmem:[%s1721_s1 + $0x70] sm:$0xf]  ;;  %v1295_v29 = vld [vmem:[%s1721_s1 + $0x74] sm:$0xf] }
   0xf   :  { %v1300_v30 = vld [vmem:[%s1721_s1 + $0x78] sm:$0xf]  ;;  %v1305_v31 = vld [vmem:[%s1721_s1 + $0x7c] sm:$0xf]  ;;  %v1310_v32 = vld [vmem:[%s1721_s1 + $0x80] sm:$0xf] }
  0x10   :  { %v1315_v33 = vld [vmem:[%s1721_s1 + $0x84] sm:$0xf]  ;;  %v1320_v34 = vld [vmem:[%s1721_s1 + $0x88] sm:$0xf]  ;;  %v1325_v35 = vld [vmem:[%s1721_s1 + $0x8c] sm:$0xf] }
  0x11   :  { %v1330_v36 = vld [vmem:[%s1721_s1 + $0x90] sm:$0xf]  ;;  %v1335_v37 = vld [vmem:[%s1721_s1 + $0x94] sm:$0xf]  ;;  %v1340_v38 = vld [vmem:[%s1721_s1 + $0x98] sm:$0xf] }
  0x12   :  { %v1345_v39 = vld [vmem:[%s1721_s1 + $0x9c] sm:$0xf]  ;;  %v1350_v40 = vld [vmem:[%s1721_s1 + $0xa0] sm:$0xf]  ;;  %v1355_v41 = vld [vmem:[%s1721_s1 + $0xa4] sm:$0xf] }
  0x13   :  { %v1360_v42 = vld [vmem:[%s1721_s1 + $0xa8] sm:$0xf]  ;;  %v1365_v43 = vld [vmem:[%s1721_s1 + $0xac] sm:$0xf]  ;;  %v1370_v44 = vld [vmem:[%s1721_s1 + $0xb0] sm:$0xf] }
  0x14   :  { %v1375_v45 = vld [vmem:[%s1721_s1 + $0xb4] sm:$0xf]  ;;  %v1380_v46 = vld [vmem:[%s1721_s1 + $0xb8] sm:$0xf]  ;;  %v1385_v47 = vld [vmem:[%s1721_s1 + $0xbc] sm:$0xf] }
  0x15   :  { %v1390_v48 = vld [vmem:[%s1721_s1 + $0xc0] sm:$0xf]  ;;  %v1395_v49 = vld [vmem:[%s1721_s1 + $0xc4] sm:$0xf] }
  0x16   :  { %v1400_v50 = vld [vmem:[%s1722_s2] ss:$0 sm:$0xff] }
  0x17 LB: > { %v1414_v52 = vcombine.low %v1310_v32, %v1315_v33  ;;  %v1753_v17 = vld [vmem:[#allocation22_spill] sm:$0xff]  ;;  %v1754_v16 = vld [vmem:[#allocation21_spill] sm:$0xff]  ;;  %v1726_v55 = vmov 0   ;;  %v1757_v19 = vld [vmem:[#allocation24_spill] sm:$0xff]  ;;  %v1433_v57 = vcombine.low %v1320_v34, %v1325_v35  ;;  %s869_s1 = sshll.u32 %s1110_s20, 2  ;;  %s921_s2 = sshll.u32 %s1110_s20, 6  ;;  %v1461_v62 = vcombine.low %v1330_v36, %v1335_v37  ;;  %s1110_s20 = sphi %s1404_s20, %s78_s20   ;;  %v1106_v51 = vphi %v1402_v51, %v1778_v51  }
  0x18   : > { %v1418_v53 = vcombine.low %v1754_v16, %v1753_v17  ;;  %v1755_v1 = vld [vmem:[#allocation6_spill] sm:$0xff]  ;;  %v1756_v0 = vld [vmem:[#allocation5_spill] sm:$0xff]  ;;  %305 = vmatprep.subr.bf16.mxu1 %v1726_v55  ;;  %v1758_v18 = vld [vmem:[#allocation23_spill] sm:$0xff]  ;;  %s1446_s23 = scalar_lea.vmem %s1720_s0, %s869_s1  ;;  %v1113_v59 = vmov 1966171168   ;;  %s1451_s26 = scalar_lea.vmem %s1723_s3, %s921_s2  ;;  %vm261_vm0 = vcmask 130048  }
  0x19   : > { %v1422_v54 = vcombine.low %v1756_v0, %v1755_v1  ;;  %v1427_v56 = vcombine.low %v1758_v18, %v1757_v19  ;;  %306 = vmatpush1.bf16.msra.mxu1 %v1414_v52  ;;  %v1759_v3 = vld [vmem:[#allocation8_spill] sm:$0xff]  ;;  %v1760_v2 = vld [vmem:[#allocation7_spill] sm:$0xff]  ;;  %v93_v60 = vunpack.c.l.s4 %v1113_v59  ;;  %v1761_v21 = vld [vmem:[#allocation26_spill] sm:$0xff]  ;;  %v1728_v1 = vlaneseq  ;;  %s78_s20 = sadd.s32 1, %s1110_s20  }
  0x1a   : > { %922 = vmatprep.subr.bf16.mxu0 %v1418_v53  ;;  %307 = vmatprep.subr.bf16.mxu1 %v1726_v55  ;;  %v1441_v58 = vcombine.low %v1760_v2, %v1759_v3  ;;  %v1762_v20 = vld [vmem:[#allocation25_spill] sm:$0xff]  ;;  %v1763_v5 = vld [vmem:[#allocation10_spill] sm:$0xff]  ;;  %v1765_v23 = vld [vmem:[#allocation28_spill] sm:$0xff]  ;;  %vm1115_vm1 = vmmov 0   ;;  %p75_p0 = scmp.ge.s32.totalorder %s78_s20, 49  }
  0x1b   : > { %923 = vmatpush3.bf16.msra.mxu0 %v1422_v54  ;;  %v1456_v61 = vcombine.low %v1762_v20, %v1761_v21  ;;  %v870_v63 = vld.sshfl [vmem:[%s1446_s23] sm:$0x33 pattern:$0x75316420]  ;;  %v94_v0 = vunpack.c.0.s8 %v93_v60  ;;  %v1766_v22 = vld [vmem:[#allocation27_spill] sm:$0xff]  ;;  %v96_v17 = vshrl.u32 %v1728_v1, 7  ;;  %v1493_v1 = vcombine.low %v1270_v24, %v1275_v25 }
  0x1c   : > { %924 = vmatprep.subr.bf16.mxu0 %v1427_v56  ;;  %v1764_v4 = vld [vmem:[#allocation9_spill] sm:$0xff]  ;;  %v907_v2 = vld.sshfl [vmem:[%s1446_s23 + $0x24c] sm:$0x33 pattern:$0x75316420]  ;;  %v1474_v3 = vcombine.low %v1766_v22, %v1765_v23  ;;  %v91_v16 = vcombine.high %v870_v63, %v870_v63  ;;  %v1767_v60 = vmov 0   ;;  %v1499_v20 = vcombine.low %v1350_v40, %v1355_v41 }
  0x1d   : > { %308 = vmatpush1.bf16.msra.mxu1 %v1433_v57  ;;  %v1468_v59 = vcombine.low %v1764_v4, %v1763_v5  ;;  %v586_v4 = vcombine.high %v907_v2, %v907_v2  ;;  %v1768_v7 = vld [vmem:[#allocation12_spill] sm:$0xff]  ;;  %v1769_v6 = vld [vmem:[#allocation11_spill] sm:$0xff]  ;;  %v1488_v18 = vsub.s32 %v94_v0, %v96_v17  ;;  %v1770_v9 = vld [vmem:[#allocation14_spill] sm:$0xff]  ;;  %v1568_v22 = vcombine.low %v1390_v48, %v1395_v49  ;;  %s1116_s0 = smov (%p75_p0), [#allocation2]  }
  0x1e   : > { %309 = vmatprep.subr.bf16.mxu1 %v1726_v55  ;;  %v1480_v55 = vcombine.low %v1340_v38, %v1345_v39  ;;  %v1486_v5 = vcombine.low %v1769_v6, %v1768_v7  ;;  %v1771_v8 = vld [vmem:[#allocation13_spill] sm:$0xff]  ;;  %v1516_v7 = vcombine.low %v1280_v26, %v1285_v27  ;;  %v1772_v11 = vld [vmem:[#allocation16_spill] sm:$0xff]  ;;  %v1773_v10 = vld [vmem:[#allocation15_spill] sm:$0xff]  ;;  %vm819_vm2 = vcmask (%p75_p0), 1041408   ;;  %s840_s3 = sshll.u32 (%p75_p0), %s1116_s0, 4  ;;  %s841_s3 = int_to_ptr.vmem [resolvable:$true] %s840_s3 }
  0x1f   : > { %925 = vmatpush3.bf16.msra.mxu0 %v1441_v58  ;;  %v105_v19 = vrot.slane %v91_v16, %v1488_v18  ;;  %v1502_v6 = vrot.slane %v586_v4, %v1488_v18  ;;  %v1505_v0 = vrot.slane %v907_v2, %v1488_v18  ;;  %v1511_v16 = vcombine.low %v1771_v8, %v1770_v9  ;;  %v1774_v13 = vld [vmem:[#allocation18_spill] sm:$0xff]  ;;  %v1775_v12 = vld [vmem:[#allocation17_spill] sm:$0xff]  ;;  %v1776_v15 = vld [vmem:[#allocation20_spill] sm:$0xff]  ;;  %p1077_p2 = scmp.lt.s32.totalorder (%p75_p0), %s841_s3, %s841_s3 }
  0x20   : > { %926 = vmatprep.subr.bf16.mxu0 %v1456_v61  ;;  %v1522_v2 = vcombine.low %v1360_v42, %v1365_v43  ;;  %v1528_v4 = vcombine.low %v1773_v10, %v1772_v11  ;;  %v1544_v8 = vcombine.low %v1775_v12, %v1774_v13  ;;  %v899_v9 = vld.sshfl [vmem:[%s1446_s23 + $0xc4] sm:$0x33 pattern:$0x75316420]  ;;  %v1550_v10 = vcombine.low %v1300_v30, %v1305_v31  ;;  %v1777_v14 = vld [vmem:[#allocation19_spill] sm:$0xff] }
  0x21   : > { %310 = vmatpush1.bf16.msra.mxu1 %v1461_v62  ;;  %v107_v17 = vcombine.high %v105_v19, %v105_v19  ;;  %297 = vmatprep.mubr.bf16.mxu0 %v105_v19  ;;  %v1533_v19 = vcombine.low %v1290_v28, %v1295_v29  ;;  %v1555_v11 = vcombine.low %v1380_v46, %v1385_v47 }
  0x22   : > { %311 = vmatprep.subr.bf16.mxu1 %v1767_v60  ;;  %v356_v21 = vcombine.high %v899_v9, %v899_v9  ;;  %v1561_v12 = vcombine.low %v1777_v14, %v1776_v15  ;;  %v98_v13 = vrot.slane %v870_v63, %v1488_v18 }
  0x23   : > { %927 = vmatpush3.bf16.msra.mxu0 %v1468_v59  ;;  %896 = vmatprep.mubr.msk.bf16.mxu1 %vm261_vm0, %v107_v17  ;;  %v1538_v17 = vcombine.low %v1370_v44, %v1375_v45 }
  0x24   : > { %928 = vmatprep.subr.bf16.mxu0 %v1474_v3  ;;  %v370_v23 = vrot.slane %v356_v21, %v1488_v18  ;;  %v106_v14 = vcombine.high %v98_v13, %v98_v13 }
  0x25   : > { %312 = vmatpush1.bf16.msra.mxu1 %v1480_v55 }
  0x26   : > { %313 = vmatprep.subr.bf16.mxu1 %v1767_v60  ;;  %v372_v15 = vcombine.high %v370_v23, %v370_v23 }
  0x27   : > { %929 = vmatpush3.bf16.msra.mxu0 %v1486_v5 }
  0x28   : > { %930 = vmatprep.subr.bf16.mxu0 %v1493_v1 }
  0x29   : > { %314 = vmatpush1.bf16.msra.mxu1 %v1499_v20 }
  0x2a   : > { %315 = vmatprep.subr.bf16.mxu1 %v1767_v60 }
  0x2b   : > { %931 = vmatpush3.bf16.msra.mxu0 %v1511_v16 }
  0x2c   : > { %932 = vmatprep.subr.bf16.mxu0 %v1516_v7 }
  0x2d   : > { %316 = vmatpush1.bf16.msra.mxu1 %v1522_v2 }
  0x2e   : > { %317 = vmatprep.subr.bf16.mxu1 %v1767_v60 }
  0x2f   : > { %933 = vmatpush3.bf16.msra.mxu0 %v1528_v4 }
  0x30   : > { %934 = vmatprep.subr.bf16.mxu0 %v1533_v19 }
  0x31   : > { %318 = vmatpush1.bf16.msra.mxu1 %v1538_v17 }
  0x32   : > { %319 = vmatprep.subr.bf16.mxu1 %v1767_v60 }
  0x33   : > { %935 = vmatpush3.bf16.msra.mxu0 %v1544_v8 }
  0x34   : > { %936 = vmatprep.subr.bf16.mxu0 %v1550_v10 }
  0x35   : > { %320 = vmatpush1.bf16.msra.mxu1 %v1555_v11 }
  0x36   : > { %321 = vmatprep.subr.bf16.mxu1 %v1767_v60 }
  0x37   : > { %937 = vmatpush3.bf16.msra.mxu0 %v1561_v12 }
  0x38   : > { %944 = vmatprep.subr.bf16.mxu0 %v1418_v53 }
  0x39   : > { %322 = vmatpush1.bf16.msra.mxu1 %v1568_v22 }
  0x3a   : > { %298 = vmatmul.mubr.bf16.vlgmr.msra.gmra.mrb[0].mxu0 %v98_v13  ;;  %419 = vmatprep.subr.bf16.mxu1 %v1767_v60  ;;  %v903_v13 = vld.sshfl [vmem:[%s1446_s23 + $0x188] sm:$0x33 pattern:$0x75316420] }
  0x3b   : > { %945 = vmatpush3.bf16.msra.mxu0 %v1422_v54  ;;  %411 = vmatprep.mubr.bf16.mxu0 %v370_v23  ;;  %v478_v63 = vrot.slane %v903_v13, %v1488_v18 }
  0x3c   : > { %946 = vmatprep.subr.bf16.mxu0 %v1427_v56  ;;  %338 = vmatmul.mubr.bf16.vlgmr.msra.gmra.mrb[0].mxu1 %v106_v14  ;;  %v471_v14 = vcombine.high %v903_v13, %v903_v13 }
  0x3d   : > { %420 = vmatpush1.bf16.msra.mxu1 %v1414_v52  ;;  %900 = vmatprep.mubr.msk.bf16.mxu1 %vm261_vm0, %v372_v15  ;;  %v363_v15 = vrot.slane %v899_v9, %v1488_v18 }
  0x3e   : > { %421 = vmatprep.subr.bf16.mxu1 %v1767_v60  ;;  %v485_v21 = vrot.slane %v471_v14, %v1488_v18  ;;  %v486_v18 = vcombine.high %v478_v63, %v478_v63 }
  0x3f   : > { %947 = vmatpush3.bf16.msra.mxu0 %v1441_v58  ;;  %v371_v23 = vcombine.high %v363_v15, %v363_v15 }
  0x40   : > { %948 = vmatprep.subr.bf16.mxu0 %v1456_v61  ;;  %v487_v9 = vcombine.high %v485_v21, %v485_v21 }
  0x41   : > { %422 = vmatpush1.bf16.msra.mxu1 %v1433_v57 }
  0x42   : > { %423 = vmatprep.subr.bf16.mxu1 %v1767_v60 }
  0x43   : > { %949 = vmatpush3.bf16.msra.mxu0 %v1468_v59 }
  0x44   : > { %950 = vmatprep.subr.bf16.mxu0 %v1474_v3 }
  0x45   : > { %424 = vmatpush1.bf16.msra.mxu1 %v1461_v62 }
  0x46   : > { %425 = vmatprep.subr.bf16.mxu1 %v1767_v60 }
  0x47   : > { %951 = vmatpush3.bf16.msra.mxu0 %v1486_v5 }
  0x48   : > { %952 = vmatprep.subr.bf16.mxu0 %v1493_v1 }
  0x49   : > { %426 = vmatpush1.bf16.msra.mxu1 %v1480_v55 }
  0x4a   : > { %427 = vmatprep.subr.bf16.mxu1 %v1767_v60 }
  0x4b   : > { %953 = vmatpush3.bf16.msra.mxu0 %v1511_v16 }
  0x4c   : > { %954 = vmatprep.subr.bf16.mxu0 %v1516_v7 }
  0x4d   : > { %428 = vmatpush1.bf16.msra.mxu1 %v1499_v20 }
  0x4e   : > { %429 = vmatprep.subr.bf16.mxu1 %v1767_v60 }
  0x4f   : > { %955 = vmatpush3.bf16.msra.mxu0 %v1528_v4 }
  0x50   : > { %956 = vmatprep.subr.bf16.mxu0 %v1533_v19 }
  0x51   : > { %430 = vmatpush1.bf16.msra.mxu1 %v1522_v2 }
  0x52   : > { %431 = vmatprep.subr.bf16.mxu1 %v1767_v60 }
  0x53   : > { %957 = vmatpush3.bf16.msra.mxu0 %v1544_v8 }
  0x54   : > { %958 = vmatprep.subr.bf16.mxu0 %v1550_v10 }
  0x55   : > { %432 = vmatpush1.bf16.msra.mxu1 %v1538_v17 }
  0x56   : > { %433 = vmatprep.subr.bf16.mxu1 %v1767_v60 }
  0x57   : > { %959 = vmatpush3.bf16.msra.mxu0 %v1561_v12 }
  0x58   : > { %966 = vmatprep.subr.bf16.mxu0 %v1418_v53 }
  0x59   : > { %434 = vmatpush1.bf16.msra.mxu1 %v1555_v11 }
  0x5a   : > { %412 = vmatmul.mubr.bf16.vlgmr.msra.gmra.mrb[4].mxu0 %v363_v15  ;;  %435 = vmatprep.subr.bf16.mxu1 %v1767_v60 }
  0x5b   : > { %967 = vmatpush3.bf16.msra.mxu0 %v1422_v54  ;;  %526 = vmatprep.mubr.bf16.mxu0 %v485_v21 }
  0x5c   : > { %968 = vmatprep.subr.bf16.mxu0 %v1427_v56 }
  0x5d   : > { %436 = vmatpush1.bf16.msra.mxu1 %v1568_v22 }
  0x5e   : > { %534 = vmatprep.subr.bf16.mxu1 %v1767_v60 }
  0x5f   : > { %969 = vmatpush3.bf16.msra.mxu0 %v1441_v58 }
  0x60   : > { %970 = vmatprep.subr.bf16.mxu0 %v1456_v61  ;;  %452 = vmatmul.mubr.bf16.vlgmr.msra.gmra.mrb[4].mxu1 %v371_v23 }
  0x61   : > { %535 = vmatpush1.bf16.msra.mxu1 %v1414_v52  ;;  %904 = vmatprep.mubr.msk.bf16.mxu1 %vm261_vm0, %v487_v9 }
  0x62   : > { %536 = vmatprep.subr.bf16.mxu1 %v1767_v60 }
  0x63   : > { %971 = vmatpush3.bf16.msra.mxu0 %v1468_v59 }
  0x64   : > { %972 = vmatprep.subr.bf16.mxu0 %v1474_v3 }
  0x65   : > { %537 = vmatpush1.bf16.msra.mxu1 %v1433_v57 }
  0x66   : > { %538 = vmatprep.subr.bf16.mxu1 %v1767_v60 }
  0x67   : > { %973 = vmatpush3.bf16.msra.mxu0 %v1486_v5 }
  0x68   : > { %974 = vmatprep.subr.bf16.mxu0 %v1493_v1 }
  0x69   : > { %539 = vmatpush1.bf16.msra.mxu1 %v1461_v62 }
  0x6a   : > { %540 = vmatprep.subr.bf16.mxu1 %v1767_v60 }
  0x6b   : > { %975 = vmatpush3.bf16.msra.mxu0 %v1511_v16 }
  0x6c   : > { %976 = vmatprep.subr.bf16.mxu0 %v1516_v7 }
  0x6d   : > { %541 = vmatpush1.bf16.msra.mxu1 %v1480_v55 }
  0x6e   : > { %542 = vmatprep.subr.bf16.mxu1 %v1767_v60 }
  0x6f   : > { %977 = vmatpush3.bf16.msra.mxu0 %v1528_v4 }
  0x70   : > { %978 = vmatprep.subr.bf16.mxu0 %v1533_v19 }
  0x71   : > { %543 = vmatpush1.bf16.msra.mxu1 %v1499_v20 }
  0x72   : > { %544 = vmatprep.subr.bf16.mxu1 %v1767_v60 }
  0x73   : > { %979 = vmatpush3.bf16.msra.mxu0 %v1544_v8 }
  0x74   : > { %980 = vmatprep.subr.bf16.mxu0 %v1550_v10 }
  0x75   : > { %545 = vmatpush1.bf16.msra.mxu1 %v1522_v2 }
  0x76   : > { %546 = vmatprep.subr.bf16.mxu1 %v1767_v60 }
  0x77   : > { %981 = vmatpush3.bf16.msra.mxu0 %v1561_v12 }
  0x78   : > { %988 = vmatprep.subr.bf16.mxu0 %v1418_v53  ;;  %v602_v53 = vcombine.high %v1502_v6, %v1502_v6 }
  0x79   : > { %547 = vmatpush1.bf16.msra.mxu1 %v1538_v17 }
  0x7a   : > { %527 = vmatmul.mubr.bf16.vlgmr.msra.gmra.mrb[8].mxu0 %v478_v63  ;;  %548 = vmatprep.subr.bf16.mxu1 %v1767_v60 }
  0x7b   : > { %989 = vmatpush3.bf16.msra.mxu0 %v1422_v54  ;;  %641 = vmatprep.mubr.bf16.mxu0 %v1502_v6  ;;  %v1061_v6 = vld [vmem:[%s1451_s26 + $0x8] sm:$0xff]  }
  0x7c   : > { %990 = vmatprep.subr.bf16.mxu0 %v1427_v56 }
  0x7d   : > { %549 = vmatpush1.bf16.msra.mxu1 %v1555_v11 }
  0x7e   : > { %550 = vmatprep.subr.bf16.mxu1 %v1767_v60 }
  0x7f   : > { %991 = vmatpush3.bf16.msra.mxu0 %v1441_v58 }
  0x80   : > { %992 = vmatprep.subr.bf16.mxu0 %v1456_v61 }
  0x81   : > { %551 = vmatpush1.bf16.msra.mxu1 %v1568_v22 }
  0x82   : > { %649 = vmatprep.subr.bf16.mxu1 %v1767_v60 }
  0x83   : > { %993 = vmatpush3.bf16.msra.mxu0 %v1468_v59 }
  0x84   : > { %994 = vmatprep.subr.bf16.mxu0 %v1474_v3  ;;  %567 = vmatmul.mubr.bf16.vlgmr.msra.gmra.mrb[8].mxu1 %v486_v18  ;;  %v1060_v3 = vld [vmem:[%s1451_s26] sm:$0xff]  }
  0x85   : > { %650 = vmatpush1.bf16.msra.mxu1 %v1414_v52  ;;  %908 = vmatprep.mubr.msk.bf16.mxu1 %vm261_vm0, %v602_v53 }
  0x86   : > { %651 = vmatprep.subr.bf16.mxu1 %v1767_v60 }
  0x87   : > { %995 = vmatpush3.bf16.msra.mxu0 %v1486_v5  ;;  %v1114_v5 = vmov 0.0  }
  0x88   : > { %996 = vmatprep.subr.bf16.mxu0 %v1493_v1  ;;  %v601_v1 = vcombine.high %v1505_v0, %v1505_v0 }
  0x89   : > { %652 = vmatpush1.bf16.msra.mxu1 %v1433_v57 }
  0x8a   : > { %653 = vmatprep.subr.bf16.mxu1 %v1767_v60 }
  0x8b   : > { %997 = vmatpush3.bf16.msra.mxu0 %v1511_v16 }
  0x8c   : > { %998 = vmatprep.subr.bf16.mxu0 %v1516_v7  ;;  %v1062_v7 = vld [vmem:[%s1451_s26 + $0x10] sm:$0xff]  }
  0x8d   : > { %654 = vmatpush1.bf16.msra.mxu1 %v1461_v62 }
  0x8e   : > { %655 = vmatprep.subr.bf16.mxu1 %v1767_v60 }
  0x8f   : > { %999 = vmatpush3.bf16.msra.mxu0 %v1528_v4 }
  0x90   : > { %1000 = vmatprep.subr.bf16.mxu0 %v1533_v19 }
  0x91   : > { %656 = vmatpush1.bf16.msra.mxu1 %v1480_v55 }
  0x92   : > { %657 = vmatprep.subr.bf16.mxu1 %v1767_v60 }
  0x93   : > { %1001 = vmatpush3.bf16.msra.mxu0 %v1544_v8  ;;  %v1063_v8 = vld [vmem:[%s1451_s26 + $0x18] sm:$0xff]  }
  0x94   : > { %1002 = vmatprep.subr.bf16.mxu0 %v1550_v10  ;;  %v1064_v10 = vld [vmem:[%s1451_s26 + $0x20] sm:$0xff]  }
  0x95   : > { %658 = vmatpush1.bf16.msra.mxu1 %v1499_v20  ;;  %v1067_v20 = vld [vmem:[%s1451_s26 + $0x38] sm:$0xff]  }
  0x96   : > { %659 = vmatprep.subr.bf16.mxu1 %v1767_v60 }
  0x97   : > { %1003 = vmatpush3.bf16.msra.mxu0 %v1561_v12  ;;  %v1066_v12 = vld [vmem:[%s1451_s26 + $0x30] sm:$0xff]  }
  0x98   : > { %1019 = vmatprep.subr.bf16.mxu0 %v1114_v5 }
  0x99   : > { %660 = vmatpush1.bf16.msra.mxu1 %v1522_v2 }
  0x9a   : > { %642 = vmatmul.mubr.bf16.vlgmr.msra.gmra.mrb[12].mxu0 %v1505_v0  ;;  %661 = vmatprep.subr.bf16.mxu1 %v1767_v60 }
  0x9b   : > { %1020 = vmatpush3.bf16.msra.mxu0 %v1060_v3  ;;  %1035 = vmatprep.mubr.msk.bf16.mxu0 %vm1115_vm1, %v1114_v5 }
  0x9c   : > { %1021 = vmatprep.subr.bf16.mxu0 %v1114_v5 }
  0x9d   : > { %662 = vmatpush1.bf16.msra.mxu1 %v1538_v17 }
  0x9e   : > { %663 = vmatprep.subr.bf16.mxu1 %v1767_v60 }
  0x9f   : > { %1022 = vmatpush3.bf16.msra.mxu0 %v1061_v6 }
  0xa0   : > { %1023 = vmatprep.subr.bf16.mxu0 %v1114_v5 }
  0xa1   : > { %664 = vmatpush1.bf16.msra.mxu1 %v1555_v11  ;;  %v1065_v11 = vld [vmem:[%s1451_s26 + $0x28] sm:$0xff]  }
  0xa2   : > { %665 = vmatprep.subr.bf16.mxu1 %v1767_v60 }
  0xa3   : > { %1024 = vmatpush3.bf16.msra.mxu0 %v1062_v7 }
  0xa4   : > { %1025 = vmatprep.subr.bf16.mxu0 %v1114_v5 }
  0xa5   : > { %666 = vmatpush1.bf16.msra.mxu1 %v1568_v22 }
  0xa7   : > { %1026 = vmatpush3.bf16.msra.mxu0 %v1063_v8 }
  0xa8   : > { %682 = vmatmul.mubr.bf16.vlgmr.msra.gmra.mrb[12].mxu1 %v601_v1  ;;  %1027 = vmatprep.subr.bf16.mxu0 %v1114_v5 }
  0xab   : > { %1028 = vmatpush3.bf16.msra.mxu0 %v1064_v10 }
  0xac   : > { %1029 = vmatprep.subr.bf16.mxu0 %v1114_v5 }
  0xaf   : > { %1030 = vmatpush3.bf16.msra.mxu0 %v1065_v11 }
  0xb0   : > { %1031 = vmatprep.subr.bf16.mxu0 %v1114_v5 }
  0xb3   : > { %1032 = vmatpush3.bf16.msra.mxu0 %v1066_v12 }
  0xb4   : > { %1033 = vmatprep.subr.bf16.mxu0 %v1114_v5 }
  0xb7   : > { %1034 = vmatpush3.bf16.msra.mxu0 %v1067_v20 }
 0x10d   : > { %v938_v22 = vpop.f32.mrb[0].mxu0 }
 0x10e   : > { %v939_v52 = vpop.f32.mrb[1].mxu0 }
 0x10f   : > { %v940_v54 = vadd.f32 %v939_v52, %v938_v22  ;;  %v941_v55 = vpop.f32.mrb[2].mxu0  ;;  %v339_v56 = vpop.f32.mrb[0].mxu1 }
 0x110   : > { %v942_v57 = vpop.f32.mrb[3].mxu0  ;;  %v341_v61 = vpop.f32.mrb[1].mxu1 }
 0x111   : > { %v340_v58 = vadd.f32 %v940_v54, %v339_v56  ;;  %v342_v62 = vpop.f32.mrb[2].mxu1 }
 0x112   : > { %v343_v59 = vpop.f32.mrb[3].mxu1 }
 0x12d   : > { %v960_v60 = vpop.f32.mrb[4].mxu0 }
 0x12e   : > { %v961_v0 = vpop.f32.mrb[5].mxu0 }
 0x12f   : > { %v962_v16 = vadd.f32 %v961_v0, %v960_v60  ;;  %v963_v2 = vpop.f32.mrb[6].mxu0 }
 0x130   : > { %v964_v4 = vpop.f32.mrb[7].mxu0 }
 0x133   : > { %v453_v19 = vpop.f32.mrb[4].mxu1 }
 0x134   : > { %v454_v17 = vadd.f32 %v962_v16, %v453_v19  ;;  %v455_v13 = vpop.f32.mrb[5].mxu1  ;;  %v920_v19 = vld [vmem:[%s1724_s4] ss:$0 sm:$0xff] (%p75_p0)  ;;  %s1072_s4 = scalar_lea.vmem (%p75_p0), %s841_s3, 32 }
 0x135   : > { %v456_v14 = vpop.f32.mrb[6].mxu1  ;;  %p1073_p1 = scmp.ne.s32.totalorder (%p75_p0), %s841_s3, %s1072_s4  ;;  %p1078_p3 = scmp.lt.s32.totalorder (%p75_p0), %s1072_s4, %s1072_s4 }
 0x136   : > { %v459_v15 = vmax.f32 %v340_v58, %v454_v17  ;;  %v457_v21 = vpop.f32.mrb[7].mxu1  ;;  %v1779_v17 = vlaneseq (%p75_p0) }
 0x137   :  { %p1079_p4 = por (%p75_p0), %p1078_p3, %p1077_p2 }
 0x138   :  { %v816_v13 = vand.u32 (%p75_p0), 127, %v1779_v17 }
 0x139   :  { %p1080_p5 = pnand (%p75_p0), %p1079_p4, %p1073_p1 }
 0x13a   :  { %vm817_vm3 = vcmp.lt.s32.totalorder (%p75_p0), %v816_v13, 10 }
 0x14d   : > { %v982_v23 = vpop.f32.mrb[8].mxu0 }
 0x14e   : > { %v983_v9 = vpop.f32.mrb[9].mxu0 }
 0x14f   : > { %v984_v63 = vadd.f32 %v983_v9, %v982_v23  ;;  %v985_v18 = vpop.f32.mrb[10].mxu0 }
 0x150   : > { %v986_v53 = vpop.f32.mrb[11].mxu0 }
 0x157   : > { %v568_v1 = vpop.f32.mrb[8].mxu1 }
 0x158   : > { %v569_v3 = vadd.f32 %v984_v63, %v568_v1  ;;  %v570_v5 = vpop.f32.mrb[9].mxu1 }
 0x159   : > { %v571_v6 = vpop.f32.mrb[10].mxu1 }
 0x15a   : > { %v574_v7 = vmax.f32 %v459_v15, %v569_v3  ;;  %v572_v8 = vpop.f32.mrb[11].mxu1 }
 0x16d   : > { %v1004_v10 = vpop.f32.mrb[12].mxu0 }
 0x16e   : > { %v1005_v11 = vpop.f32.mrb[13].mxu0 }
 0x16f   : > { %v1006_v12 = vadd.f32 %v1005_v11, %v1004_v10  ;;  %v1007_v20 = vpop.f32.mrb[14].mxu0 }
 0x170   : > { %v1008_v22 = vpop.f32.mrb[15].mxu0 }
 0x17b   : > { %v683_v52 = vpop.f32.mrb[12].mxu1 }
 0x17c   : > { %v684_v54 = vadd.f32 %v1006_v12, %v683_v52  ;;  %v685_v55 = vpop.f32.mrb[13].mxu1 }
 0x17d   : > { %v686_v56 = vpop.f32.mrb[14].mxu1 }
 0x17e   : > { %v689_v57 = vmax.f32 %v574_v7, %v684_v54  ;;  %v687_v58 = vpop.f32.mrb[15].mxu1 }
 0x180   : > { %v696_v61 = vadd.f32 %v1400_v50, %v689_v57 }
 0x182   : > { %v697_v62 = vmax.f32 %v696_v61, 0.0 }
 0x184   : > { %v698_v59 = vpack.c.bf16 %v697_v62, %v697_v62 }
 0x186   : > { %1036 = vmatmul.mubr.bf16.vlgmr.msra.gmra.mrb[16].mxu0 %v698_v59 }
 0x256   :  { %77 = sbr.rel (!%p75_p0) target bundleno = 23 (0x17), region = 52 }
 0x259   : > { %v800_v60 = vpop.f32.mrb[16].mxu0 }
 0x25a   : > { %v806_v0 = vadd.f32 %v1106_v51, %v800_v60   ;;  %v1037_v16 = vpop.f32.mrb[17].mxu0 }
 0x25b   : > { %v803_v2 = vpop.f32.mrb[18].mxu0 }
 0x25c   : > { %v1038_v4 = vpop.f32.mrb[19].mxu0  ;;  %v1778_v51 = vmov %v806_v0  ;;  %v814_v14 = vadd.f32 (%p75_p0), %v920_v19, %v806_v0 }
 0x25e   :  { %v818_v51 = vsel %vm817_vm3, %v814_v14, -1e+30 }
 0x25f   :  { %v820_v15 = vsel %vm819_vm2, %v818_v51, -inf }
 0x260   :  { %821 = vmax.xlane.f32.xlu0 %v820_v15 }
 0x2ed   :  { %v822_v21 = vpop.xlane.xlu0 %821 }
 0x2ee   :  { %v823_v23 = vsub.f32 %v814_v14, %v822_v21 }
 0x2f0   :  { %v824_v9 = vmul.f32 1.442695, %v823_v23 }
 0x2f2   :  { %1068 = vpow2.f32 %v824_v9 }
 0x2fc   :  { %v1069_v63 = vpop.eup %1068 }
 0x2fd   :  { %v826_v18 = vsel %vm817_vm3, %v1069_v63, 0.0 }
 0x2fe   :  { %v827_v53 = vsel %vm819_vm2, %v826_v18, 0.0 }
 0x2ff   :  { %828 = vadd.xlane.f32.xlu0 %v827_v53 }
 0x38c   :  { %v829_v24 = vpop.xlane.xlu0 %828 }
 0x38d   :  { %1070 = vlog2.f32 %v829_v24 }
 0x397   :  { %v1071_v25 = vpop.eup %1070 }
 0x398   :  { %v831_v26 = vmul.f32 0.6931472, %v1071_v25 }
 0x39a   :  { %v832_v27 = vsub.f32 %v823_v23, %v831_v26 }
 0x39c   :  { %833 = vst [vmem:[#allocation2] sm:$0x3] %v832_v27 }
 0x39d   :  { %1083 = shalt.err (!%p1080_p5)
}
 0x39e   :  { %s1084_s6 = scalar_lea.hbm %s1725_s5, 32 }
 0x39f   :  { %p1085_p6 = scmp.ne.s32.totalorder %s1725_s5, %s1084_s6  ;;  %p1088_p7 = scmp.lt.u32.totalorder %s1084_s6, %s1725_s5 }
 0x3a1   :  { %p1090_p8 = pnand %p1088_p7, %p1085_p6 }
 0x3a3   :  { %1093 = shalt.err (!%p1090_p8)
}
 0x3a4   :  { %843 = dma.vmem_to_hbm [thread:$0]  %s841_s3, 32, %s1725_s5, [#allocation3]  }
 0x3a5   :  { %1102 = dma.done.wait [#allocation3], 32  }
 0x3a6   :  { %1103 = vsyncadd [#allocation3], 4294967264 }
 0x3a7   :  { %847 = vsyncpa [#allocation3], 1 }

</bundles_post_ra>
